<compile_context>
chip_gen: v7x
topology: tpu7x:2x2x1
jax: 0.10.0
libtpu: 0.0.40
codegen_flags: <defaults>
</compile_context>

<pallas_src>
import numpy as np

import jax
import jax.numpy as jnp
from jax.experimental import pallas as pl
from jax.experimental.pallas import tpu as pltpu

# ----------------------------- model config ---------------------------------
C1_OUT = 3
C2_OUT = 8
FC1_OUT = 70
FC2_OUT = 30
KER = 5
N_CLASSES = 10
N_INP_CHANNELS = 1
IMG = 28

CONV1_W = IMG - KER + 1          # 24  (conv1 output spatial)
POOL1_W = CONV1_W // 2           # 12
CONV2_W = POOL1_W - KER + 1      # 8   (conv2 output spatial)
POOL2_W = CONV2_W // 2           # 4
F_LENGTH = POOL2_W * POOL2_W * C2_OUT   # 128


# ------------------- static 2x2-maxpool selection matrices -------------------
def _pair_rows(n_out):
    """S[p] @ Y selects rows 2i+p:  S shape (2, n_out, 2*n_out)."""
    s = np.zeros((2, n_out, 2 * n_out), np.float32)
    for p in range(2):
        s[p, np.arange(n_out), 2 * np.arange(n_out) + p] = 1.0
    return s


def _pair_cols(n_ch, w_out):
    """Z @ T[p] selects column c*2w + 2j + p into c*w + j (per channel block)."""
    t = np.zeros((2, n_ch * 2 * w_out, n_ch * w_out), np.float32)
    for p in range(2):
        for c in range(n_ch):
            t[p, c * 2 * w_out + 2 * np.arange(w_out) + p,
              c * w_out + np.arange(w_out)] = 1.0
    return t


_S1 = _pair_rows(POOL1_W)            # (2, 12, 24)
_T1 = _pair_cols(C1_OUT, POOL1_W)    # (2, 72, 36)
_S2 = _pair_rows(POOL2_W)            # (2, 4, 8)
_T2 = _pair_cols(C2_OUT, POOL2_W)    # (2, 64, 32)


# -------------------- host-side (glue) weight re-packing ---------------------
def _conv1_banded(w1):
    """(C1_OUT,1,5,5) -> (KER, IMG, C1_OUT*CONV1_W) banded matmul weights."""
    co, ki, kj, wo = np.meshgrid(np.arange(C1_OUT), np.arange(KER),
                                 np.arange(KER), np.arange(CONV1_W),
                                 indexing="ij")
    co, ki, kj, wo = co.ravel(), ki.ravel(), kj.ravel(), wo.ravel()
    vals = w1[co, 0, ki, kj]
    mat = jnp.zeros((KER, IMG, C1_OUT * CONV1_W), jnp.float32)
    return mat.at[ki, wo + kj, co * CONV1_W + wo].set(vals)


def _conv2_banded(w2):
    """(C2_OUT,C1_OUT,5,5) -> (KER, C1_OUT*POOL1_W, C2_OUT*CONV2_W)."""
    co, ci, ki, kj, wo = np.meshgrid(np.arange(C2_OUT), np.arange(C1_OUT),
                                     np.arange(KER), np.arange(KER),
                                     np.arange(CONV2_W), indexing="ij")
    co, ci, ki, kj, wo = (co.ravel(), ci.ravel(), ki.ravel(),
                          kj.ravel(), wo.ravel())
    vals = w2[co, ci, ki, kj]
    mat = jnp.zeros((KER, C1_OUT * POOL1_W, C2_OUT * CONV2_W), jnp.float32)
    return mat.at[ki, ci * POOL1_W + wo + kj, co * CONV2_W + wo].set(vals)


def _fc1_permuted(fc1_w):
    """Fold the PyTorch NCHW flatten into fc1: -> (POOL2_W, C2_OUT*POOL2_W, FC1_OUT).

    The kernel's pooled2 layout is [h, co*POOL2_W + w]; PyTorch flattens as
    co*16 + h*4 + w.  fc1_wp[h, co*4+w, :] = fc1_w.T[co*16 + h*4 + w, :].
    """
    h, co, w = np.meshgrid(np.arange(POOL2_W), np.arange(C2_OUT),
                           np.arange(POOL2_W), indexing="ij")
    src = (co * POOL2_W * POOL2_W + h * POOL2_W + w).reshape(
        POOL2_W, C2_OUT * POOL2_W)
    return fc1_w.T[src, :]


# ------------------------------ Pallas kernel --------------------------------
def _convnet_kernel(x_ref, w1_ref, b1_ref, w2_ref, b2_ref,
                    s1_ref, t1_ref, s2_ref, t2_ref,
                    fc1w_ref, fc1b_ref, fc2w_ref, fc2b_ref, fc3w_ref, fc3b_ref,
                    o_ref):
    def mm(a, b):
        return jnp.dot(a, b, preferred_element_type=jnp.float32)

    s1e, s1o = s1_ref[0], s1_ref[1]
    t1e, t1o = t1_ref[0], t1_ref[1]
    s2e, s2o = s2_ref[0], s2_ref[1]
    t2e, t2o = t2_ref[0], t2_ref[1]

    fc1_rows = []
    for b in range(x_ref.shape[0]):                 # small static batch, unrolled
        xb = x_ref[b]                               # (28, 28)

        # ---- conv1 + bias + ReLU: sum of KER row-shifted matmuls -> (24, 72)
        c1 = b1_ref[...]                            # (1, 72) broadcast
        for ki in range(KER):
            c1 = c1 + mm(xb[ki:ki + CONV1_W, :], w1_ref[ki])
        c1 = jnp.maximum(c1, 0.0)

        # ---- fused 2x2 max-pool (selection matmuls + max) -> (12, 36)
        z1 = jnp.maximum(mm(s1e, c1), mm(s1o, c1))
        p1 = jnp.maximum(mm(z1, t1e), mm(z1, t1o))

        # ---- conv2 + bias + ReLU -> (8, 64)
        c2 = b2_ref[...]                            # (1, 64) broadcast
        for ki in range(KER):
            c2 = c2 + mm(p1[ki:ki + CONV2_W, :], w2_ref[ki])
        c2 = jnp.maximum(c2, 0.0)

        # ---- fused 2x2 max-pool -> (4, 32)
        z2 = jnp.maximum(mm(s2e, c2), mm(s2o, c2))
        p2 = jnp.maximum(mm(z2, t2e), mm(z2, t2o))

        # ---- flatten (NCHW order baked into permuted fc1 weights) + fc1 pre-act
        acc = fc1b_ref[...]                         # (1, 70)
        for h in range(POOL2_W):
            acc = acc + mm(p2[h:h + 1, :], fc1w_ref[h])
        fc1_rows.append(acc)

    # ---- fc1 ReLU, then fc2/fc3 batched over B (all resident in vregs) ----
    h1 = jnp.maximum(jnp.concatenate(fc1_rows, axis=0), 0.0)        # (B, 70)
    h2 = jnp.maximum(mm(h1, fc2w_ref[...]) + fc2b_ref[...], 0.0)    # (B, 30)
    o_ref[...] = mm(h2, fc3w_ref[...]) + fc3b_ref[...]              # (B, 10)


# ------------------------------ forward pass ---------------------------------
def convnet_forward(params, x_nchw):
    B = x_nchw.shape[0]
    x = x_nchw.reshape(B, IMG, IMG).astype(jnp.float32)      # C_in == 1

    inputs = [
        x,
        _conv1_banded(params["w1"]),
        jnp.repeat(params["b1"], CONV1_W).reshape(1, C1_OUT * CONV1_W),
        _conv2_banded(params["w2"]),
        jnp.repeat(params["b2"], CONV2_W).reshape(1, C2_OUT * CONV2_W),
        jnp.asarray(_S1), jnp.asarray(_T1), jnp.asarray(_S2), jnp.asarray(_T2),
        _fc1_permuted(params["fc1_w"]),
        params["fc1_b"].reshape(1, FC1_OUT),
        params["fc2_w"].T,
        params["fc2_b"].reshape(1, FC2_OUT),
        params["fc3_w"].T,
        params["fc3_b"].reshape(1, N_CLASSES),
    ]

    vmem = pl.BlockSpec(memory_space=pltpu.MemorySpace.VMEM)
    return pl.pallas_call(
        _convnet_kernel,
        out_shape=jax.ShapeDtypeStruct((B, N_CLASSES), jnp.float32),
        in_specs=[vmem] * len(inputs),
        out_specs=vmem,
        cost_estimate=pl.CostEstimate(flops=4_000_000, transcendentals=0,
                                      bytes_accessed=200_000),
    )(*inputs)


# -------------------------- pure-JAX reference -------------------------------
def convnet_reference(params, x_nchw):
    prec = jax.lax.Precision.HIGHEST
    dn = ("NCHW", "OIHW", "NCHW")
    y = jax.lax.conv_general_dilated(x_nchw, params["w1"], (1, 1), "VALID",
                                     dimension_numbers=dn, precision=prec)
    y = jax.nn.relu(y + params["b1"][None, :, None, None])
    y = jax.lax.reduce_window(y, -jnp.inf, jax.lax.max,
                              (1, 1, 2, 2), (1, 1, 2, 2), "VALID")
    y = jax.lax.conv_general_dilated(y, params["w2"], (1, 1), "VALID",
                                     dimension_numbers=dn, precision=prec)
    y = jax.nn.relu(y + params["b2"][None, :, None, None])
    y = jax.lax.reduce_window(y, -jnp.inf, jax.lax.max,
                              (1, 1, 2, 2), (1, 1, 2, 2), "VALID")
    flat = y.reshape(y.shape[0], -1)
    h = jax.nn.relu(flat @ params["fc1_w"].T + params["fc1_b"])
    h = jax.nn.relu(h @ params["fc2_w"].T + params["fc2_b"])
    return h @ params["fc3_w"].T + params["fc3_b"]


# ----------------------------- parameter init --------------------------------
def init_params(key):
    """Deterministic PyTorch-like uniform(-1/sqrt(fan_in), +) init."""
    def uinit(k, shape, fan_in):
        bound = 1.0 / jnp.sqrt(float(fan_in))
        return jax.random.uniform(k, shape, jnp.float32, -bound, bound)

    ks = jax.random.split(key, 10)
    p = {}
    p["w1"] = uinit(ks[0], (C1_OUT, N_INP_CHANNELS, KER, KER),
                    N_INP_CHANNELS * KER * KER)
    p["b1"] = uinit(ks[1], (C1_OUT,), N_INP_CHANNELS * KER * KER)
    p["w2"] = uinit(ks[2], (C2_OUT, C1_OUT, KER, KER), C1_OUT * KER * KER)
    p["b2"] = uinit(ks[3], (C2_OUT,), C1_OUT * KER * KER)
    p["fc1_w"] = uinit(ks[4], (FC1_OUT, F_LENGTH), F_LENGTH)
    p["fc1_b"] = uinit(ks[5], (FC1_OUT,), F_LENGTH)
    p["fc2_w"] = uinit(ks[6], (FC2_OUT, FC1_OUT), FC1_OUT)
    p["fc2_b"] = uinit(ks[7], (FC2_OUT,), FC1_OUT)
    p["fc3_w"] = uinit(ks[8], (N_CLASSES, FC2_OUT), FC2_OUT)
    p["fc3_b"] = uinit(ks[9], (N_CLASSES,), FC2_OUT)
    return p


# --------------------------------- main ---------------------------------------
if __name__ == "__main__":
    key = jax.random.PRNGKey(0)
    k_params, k_x = jax.random.split(key)

    params = init_params(k_params)
    # The module hard-codes 28x28 inputs (dim1 = (28 - ker + 1) // 2).
    x = jax.random.normal(k_x, (2, N_INP_CHANNELS, IMG, IMG), jnp.float32)

    fwd = jax.jit(convnet_forward)
    out = fwd(params, x)
    jax.block_until_ready(out)

    assert out.shape == (2, N_CLASSES), out.shape
    assert out.dtype == jnp.float32

    # Numerical cross-check against a pure-JAX/XLA reference of the module.
    ref = jax.jit(convnet_reference)(params, x)
    jax.block_until_ready(ref)
    max_err = float(jnp.max(jnp.abs(out - ref)))
    assert jnp.allclose(out, ref, atol=5e-2, rtol=5e-2), max_err

    print("KERNEL_OK")
</pallas_src>

<mosaic_0001>
module attributes {stable_mosaic.version = 11 : i64} {
  func.func @_convnet_kernel(%arg0: memref<2x28x28xf32, #tpu.memory_space<vmem>>, %arg1: memref<5x28x72xf32, #tpu.memory_space<vmem>>, %arg2: memref<1x72xf32, #tpu.memory_space<vmem>>, %arg3: memref<5x36x64xf32, #tpu.memory_space<vmem>>, %arg4: memref<1x64xf32, #tpu.memory_space<vmem>>, %arg5: memref<2x12x24xf32, #tpu.memory_space<vmem>>, %arg6: memref<2x72x36xf32, #tpu.memory_space<vmem>>, %arg7: memref<2x4x8xf32, #tpu.memory_space<vmem>>, %arg8: memref<2x64x32xf32, #tpu.memory_space<vmem>>, %arg9: memref<4x32x70xf32, #tpu.memory_space<vmem>>, %arg10: memref<1x70xf32, #tpu.memory_space<vmem>>, %arg11: memref<70x30xf32, #tpu.memory_space<vmem>>, %arg12: memref<1x30xf32, #tpu.memory_space<vmem>>, %arg13: memref<30x10xf32, #tpu.memory_space<vmem>>, %arg14: memref<1x10xf32, #tpu.memory_space<vmem>>, %arg15: memref<2x10xf32, #tpu.memory_space<vmem>>) attributes {dimension_semantics = [], scalar_prefetch = 0 : i64, scratch_operands = 0 : i64, tpu.core_type = #tpu.core_type<tc>} {
    %c0 = arith.constant 0 : index
    %c0_0 = arith.constant 0 : index
    %c0_1 = arith.constant 0 : index
    %0 = vector.load %arg5[%c0, %c0_0, %c0_1] : memref<2x12x24xf32, #tpu.memory_space<vmem>>, vector<1x12x24xf32>
    %1 = vector.shape_cast %0 : vector<1x12x24xf32> to vector<12x24xf32>
    %c1 = arith.constant 1 : index
    %c0_2 = arith.constant 0 : index
    %c0_3 = arith.constant 0 : index
    %2 = vector.load %arg5[%c1, %c0_2, %c0_3] : memref<2x12x24xf32, #tpu.memory_space<vmem>>, vector<1x12x24xf32>
    %3 = vector.shape_cast %2 : vector<1x12x24xf32> to vector<12x24xf32>
    %c0_4 = arith.constant 0 : index
    %c0_5 = arith.constant 0 : index
    %c0_6 = arith.constant 0 : index
    %4 = vector.load %arg6[%c0_4, %c0_5, %c0_6] : memref<2x72x36xf32, #tpu.memory_space<vmem>>, vector<1x72x36xf32>
    %5 = vector.shape_cast %4 : vector<1x72x36xf32> to vector<72x36xf32>
    %c1_7 = arith.constant 1 : index
    %c0_8 = arith.constant 0 : index
    %c0_9 = arith.constant 0 : index
    %6 = vector.load %arg6[%c1_7, %c0_8, %c0_9] : memref<2x72x36xf32, #tpu.memory_space<vmem>>, vector<1x72x36xf32>
    %7 = vector.shape_cast %6 : vector<1x72x36xf32> to vector<72x36xf32>
    %c0_10 = arith.constant 0 : index
    %c0_11 = arith.constant 0 : index
    %c0_12 = arith.constant 0 : index
    %8 = vector.load %arg7[%c0_10, %c0_11, %c0_12] : memref<2x4x8xf32, #tpu.memory_space<vmem>>, vector<1x4x8xf32>
    %9 = vector.shape_cast %8 : vector<1x4x8xf32> to vector<4x8xf32>
    %c1_13 = arith.constant 1 : index
    %c0_14 = arith.constant 0 : index
    %c0_15 = arith.constant 0 : index
    %10 = vector.load %arg7[%c1_13, %c0_14, %c0_15] : memref<2x4x8xf32, #tpu.memory_space<vmem>>, vector<1x4x8xf32>
    %11 = vector.shape_cast %10 : vector<1x4x8xf32> to vector<4x8xf32>
    %c0_16 = arith.constant 0 : index
    %c0_17 = arith.constant 0 : index
    %c0_18 = arith.constant 0 : index
    %12 = vector.load %arg8[%c0_16, %c0_17, %c0_18] : memref<2x64x32xf32, #tpu.memory_space<vmem>>, vector<1x64x32xf32>
    %13 = vector.shape_cast %12 : vector<1x64x32xf32> to vector<64x32xf32>
    %c1_19 = arith.constant 1 : index
    %c0_20 = arith.constant 0 : index
    %c0_21 = arith.constant 0 : index
    %14 = vector.load %arg8[%c1_19, %c0_20, %c0_21] : memref<2x64x32xf32, #tpu.memory_space<vmem>>, vector<1x64x32xf32>
    %15 = vector.shape_cast %14 : vector<1x64x32xf32> to vector<64x32xf32>
    %c0_22 = arith.constant 0 : index
    %c0_23 = arith.constant 0 : index
    %c0_24 = arith.constant 0 : index
    %16 = vector.load %arg0[%c0_22, %c0_23, %c0_24] : memref<2x28x28xf32, #tpu.memory_space<vmem>>, vector<1x28x28xf32>
    %17 = vector.shape_cast %16 : vector<1x28x28xf32> to vector<28x28xf32>
    %c0_25 = arith.constant 0 : index
    %c0_26 = arith.constant 0 : index
    %18 = vector.load %arg2[%c0_25, %c0_26] : memref<1x72xf32, #tpu.memory_space<vmem>>, vector<1x72xf32>
    %19 = vector.extract_strided_slice %17 {offsets = [0, 0], sizes = [24, 28], strides = [1, 1]} : vector<28x28xf32> to vector<24x28xf32>
    %c0_27 = arith.constant 0 : index
    %c0_28 = arith.constant 0 : index
    %c0_29 = arith.constant 0 : index
    %20 = vector.load %arg1[%c0_27, %c0_28, %c0_29] : memref<5x28x72xf32, #tpu.memory_space<vmem>>, vector<1x28x72xf32>
    %21 = vector.shape_cast %20 : vector<1x28x72xf32> to vector<28x72xf32>
    %cst = arith.constant dense<0.000000e+00> : vector<24x72xf32>
    %22 = tpu.matmul %19, %21, %cst {dimension_numbers = #tpu.dot_dimension_numbers<[1], [0], [0], [1], [0, 0, 1, 1], [], []>} : vector<24x28xf32>, vector<28x72xf32>, vector<24x72xf32> -> vector<24x72xf32>
    %23 = vector.broadcast %18 : vector<1x72xf32> to vector<24x72xf32>
    %24 = arith.addf %23, %22 : vector<24x72xf32>
    %25 = vector.extract_strided_slice %17 {offsets = [1, 0], sizes = [24, 28], strides = [1, 1]} : vector<28x28xf32> to vector<24x28xf32>
    %c1_30 = arith.constant 1 : index
    %c0_31 = arith.constant 0 : index
    %c0_32 = arith.constant 0 : index
    %26 = vector.load %arg1[%c1_30, %c0_31, %c0_32] : memref<5x28x72xf32, #tpu.memory_space<vmem>>, vector<1x28x72xf32>
    %27 = vector.shape_cast %26 : vector<1x28x72xf32> to vector<28x72xf32>
    %cst_33 = arith.constant dense<0.000000e+00> : vector<24x72xf32>
    %28 = tpu.matmul %25, %27, %cst_33 {dimension_numbers = #tpu.dot_dimension_numbers<[1], [0], [0], [1], [0, 0, 1, 1], [], []>} : vector<24x28xf32>, vector<28x72xf32>, vector<24x72xf32> -> vector<24x72xf32>
    %29 = arith.addf %24, %28 : vector<24x72xf32>
    %30 = vector.extract_strided_slice %17 {offsets = [2, 0], sizes = [24, 28], strides = [1, 1]} : vector<28x28xf32> to vector<24x28xf32>
    %c2 = arith.constant 2 : index
    %c0_34 = arith.constant 0 : index
    %c0_35 = arith.constant 0 : index
    %31 = vector.load %arg1[%c2, %c0_34, %c0_35] : memref<5x28x72xf32, #tpu.memory_space<vmem>>, vector<1x28x72xf32>
    %32 = vector.shape_cast %31 : vector<1x28x72xf32> to vector<28x72xf32>
    %cst_36 = arith.constant dense<0.000000e+00> : vector<24x72xf32>
    %33 = tpu.matmul %30, %32, %cst_36 {dimension_numbers = #tpu.dot_dimension_numbers<[1], [0], [0], [1], [0, 0, 1, 1], [], []>} : vector<24x28xf32>, vector<28x72xf32>, vector<24x72xf32> -> vector<24x72xf32>
    %34 = arith.addf %29, %33 : vector<24x72xf32>
    %35 = vector.extract_strided_slice %17 {offsets = [3, 0], sizes = [24, 28], strides = [1, 1]} : vector<28x28xf32> to vector<24x28xf32>
    %c3 = arith.constant 3 : index
    %c0_37 = arith.constant 0 : index
    %c0_38 = arith.constant 0 : index
    %36 = vector.load %arg1[%c3, %c0_37, %c0_38] : memref<5x28x72xf32, #tpu.memory_space<vmem>>, vector<1x28x72xf32>
    %37 = vector.shape_cast %36 : vector<1x28x72xf32> to vector<28x72xf32>
    %cst_39 = arith.constant dense<0.000000e+00> : vector<24x72xf32>
    %38 = tpu.matmul %35, %37, %cst_39 {dimension_numbers = #tpu.dot_dimension_numbers<[1], [0], [0], [1], [0, 0, 1, 1], [], []>} : vector<24x28xf32>, vector<28x72xf32>, vector<24x72xf32> -> vector<24x72xf32>
    %39 = arith.addf %34, %38 : vector<24x72xf32>
    %40 = vector.extract_strided_slice %17 {offsets = [4, 0], sizes = [24, 28], strides = [1, 1]} : vector<28x28xf32> to vector<24x28xf32>
    %c4 = arith.constant 4 : index
    %c0_40 = arith.constant 0 : index
    %c0_41 = arith.constant 0 : index
    %41 = vector.load %arg1[%c4, %c0_40, %c0_41] : memref<5x28x72xf32, #tpu.memory_space<vmem>>, vector<1x28x72xf32>
    %42 = vector.shape_cast %41 : vector<1x28x72xf32> to vector<28x72xf32>
    %cst_42 = arith.constant dense<0.000000e+00> : vector<24x72xf32>
    %43 = tpu.matmul %40, %42, %cst_42 {dimension_numbers = #tpu.dot_dimension_numbers<[1], [0], [0], [1], [0, 0, 1, 1], [], []>} : vector<24x28xf32>, vector<28x72xf32>, vector<24x72xf32> -> vector<24x72xf32>
    %44 = arith.addf %39, %43 : vector<24x72xf32>
    %cst_43 = arith.constant 0.000000e+00 : f32
    %45 = vector.broadcast %cst_43 : f32 to vector<24x72xf32>
    %46 = arith.maximumf %44, %45 : vector<24x72xf32>
    %cst_44 = arith.constant dense<0.000000e+00> : vector<12x72xf32>
    %47 = tpu.matmul %1, %46, %cst_44 {dimension_numbers = #tpu.dot_dimension_numbers<[1], [0], [0], [1], [0, 0, 1, 1], [], []>} : vector<12x24xf32>, vector<24x72xf32>, vector<12x72xf32> -> vector<12x72xf32>
    %cst_45 = arith.constant dense<0.000000e+00> : vector<12x72xf32>
    %48 = tpu.matmul %3, %46, %cst_45 {dimension_numbers = #tpu.dot_dimension_numbers<[1], [0], [0], [1], [0, 0, 1, 1], [], []>} : vector<12x24xf32>, vector<24x72xf32>, vector<12x72xf32> -> vector<12x72xf32>
    %49 = arith.maximumf %47, %48 : vector<12x72xf32>
    %cst_46 = arith.constant dense<0.000000e+00> : vector<12x36xf32>
    %50 = tpu.matmul %49, %5, %cst_46 {dimension_numbers = #tpu.dot_dimension_numbers<[1], [0], [0], [1], [0, 0, 1, 1], [], []>} : vector<12x72xf32>, vector<72x36xf32>, vector<12x36xf32> -> vector<12x36xf32>
    %cst_47 = arith.constant dense<0.000000e+00> : vector<12x36xf32>
    %51 = tpu.matmul %49, %7, %cst_47 {dimension_numbers = #tpu.dot_dimension_numbers<[1], [0], [0], [1], [0, 0, 1, 1], [], []>} : vector<12x72xf32>, vector<72x36xf32>, vector<12x36xf32> -> vector<12x36xf32>
    %52 = arith.maximumf %50, %51 : vector<12x36xf32>
    %c0_48 = arith.constant 0 : index
    %c0_49 = arith.constant 0 : index
    %53 = vector.load %arg4[%c0_48, %c0_49] : memref<1x64xf32, #tpu.memory_space<vmem>>, vector<1x64xf32>
    %54 = vector.extract_strided_slice %52 {offsets = [0, 0], sizes = [8, 36], strides = [1, 1]} : vector<12x36xf32> to vector<8x36xf32>
    %c0_50 = arith.constant 0 : index
    %c0_51 = arith.constant 0 : index
    %c0_52 = arith.constant 0 : index
    %55 = vector.load %arg3[%c0_50, %c0_51, %c0_52] : memref<5x36x64xf32, #tpu.memory_space<vmem>>, vector<1x36x64xf32>
    %56 = vector.shape_cast %55 : vector<1x36x64xf32> to vector<36x64xf32>
    %cst_53 = arith.constant dense<0.000000e+00> : vector<8x64xf32>
    %57 = tpu.matmul %54, %56, %cst_53 {dimension_numbers = #tpu.dot_dimension_numbers<[1], [0], [0], [1], [0, 0, 1, 1], [], []>} : vector<8x36xf32>, vector<36x64xf32>, vector<8x64xf32> -> vector<8x64xf32>
    %58 = vector.broadcast %53 : vector<1x64xf32> to vector<8x64xf32>
    %59 = arith.addf %58, %57 : vector<8x64xf32>
    %60 = vector.extract_strided_slice %52 {offsets = [1, 0], sizes = [8, 36], strides = [1, 1]} : vector<12x36xf32> to vector<8x36xf32>
    %c1_54 = arith.constant 1 : index
    %c0_55 = arith.constant 0 : index
    %c0_56 = arith.constant 0 : index
    %61 = vector.load %arg3[%c1_54, %c0_55, %c0_56] : memref<5x36x64xf32, #tpu.memory_space<vmem>>, vector<1x36x64xf32>
    %62 = vector.shape_cast %61 : vector<1x36x64xf32> to vector<36x64xf32>
    %cst_57 = arith.constant dense<0.000000e+00> : vector<8x64xf32>
    %63 = tpu.matmul %60, %62, %cst_57 {dimension_numbers = #tpu.dot_dimension_numbers<[1], [0], [0], [1], [0, 0, 1, 1], [], []>} : vector<8x36xf32>, vector<36x64xf32>, vector<8x64xf32> -> vector<8x64xf32>
    %64 = arith.addf %59, %63 : vector<8x64xf32>
    %65 = vector.extract_strided_slice %52 {offsets = [2, 0], sizes = [8, 36], strides = [1, 1]} : vector<12x36xf32> to vector<8x36xf32>
    %c2_58 = arith.constant 2 : index
    %c0_59 = arith.constant 0 : index
    %c0_60 = arith.constant 0 : index
    %66 = vector.load %arg3[%c2_58, %c0_59, %c0_60] : memref<5x36x64xf32, #tpu.memory_space<vmem>>, vector<1x36x64xf32>
    %67 = vector.shape_cast %66 : vector<1x36x64xf32> to vector<36x64xf32>
    %cst_61 = arith.constant dense<0.000000e+00> : vector<8x64xf32>
    %68 = tpu.matmul %65, %67, %cst_61 {dimension_numbers = #tpu.dot_dimension_numbers<[1], [0], [0], [1], [0, 0, 1, 1], [], []>} : vector<8x36xf32>, vector<36x64xf32>, vector<8x64xf32> -> vector<8x64xf32>
    %69 = arith.addf %64, %68 : vector<8x64xf32>
    %70 = vector.extract_strided_slice %52 {offsets = [3, 0], sizes = [8, 36], strides = [1, 1]} : vector<12x36xf32> to vector<8x36xf32>
    %c3_62 = arith.constant 3 : index
    %c0_63 = arith.constant 0 : index
    %c0_64 = arith.constant 0 : index
    %71 = vector.load %arg3[%c3_62, %c0_63, %c0_64] : memref<5x36x64xf32, #tpu.memory_space<vmem>>, vector<1x36x64xf32>
    %72 = vector.shape_cast %71 : vector<1x36x64xf32> to vector<36x64xf32>
    %cst_65 = arith.constant dense<0.000000e+00> : vector<8x64xf32>
    %73 = tpu.matmul %70, %72, %cst_65 {dimension_numbers = #tpu.dot_dimension_numbers<[1], [0], [0], [1], [0, 0, 1, 1], [], []>} : vector<8x36xf32>, vector<36x64xf32>, vector<8x64xf32> -> vector<8x64xf32>
    %74 = arith.addf %69, %73 : vector<8x64xf32>
    %75 = vector.extract_strided_slice %52 {offsets = [4, 0], sizes = [8, 36], strides = [1, 1]} : vector<12x36xf32> to vector<8x36xf32>
    %c4_66 = arith.constant 4 : index
    %c0_67 = arith.constant 0 : index
    %c0_68 = arith.constant 0 : index
    %76 = vector.load %arg3[%c4_66, %c0_67, %c0_68] : memref<5x36x64xf32, #tpu.memory_space<vmem>>, vector<1x36x64xf32>
    %77 = vector.shape_cast %76 : vector<1x36x64xf32> to vector<36x64xf32>
    %cst_69 = arith.constant dense<0.000000e+00> : vector<8x64xf32>
    %78 = tpu.matmul %75, %77, %cst_69 {dimension_numbers = #tpu.dot_dimension_numbers<[1], [0], [0], [1], [0, 0, 1, 1], [], []>} : vector<8x36xf32>, vector<36x64xf32>, vector<8x64xf32> -> vector<8x64xf32>
    %79 = arith.addf %74, %78 : vector<8x64xf32>
    %cst_70 = arith.constant 0.000000e+00 : f32
    %80 = vector.broadcast %cst_70 : f32 to vector<8x64xf32>
    %81 = arith.maximumf %79, %80 : vector<8x64xf32>
    %cst_71 = arith.constant dense<0.000000e+00> : vector<4x64xf32>
    %82 = tpu.matmul %9, %81, %cst_71 {dimension_numbers = #tpu.dot_dimension_numbers<[1], [0], [0], [1], [0, 0, 1, 1], [], []>} : vector<4x8xf32>, vector<8x64xf32>, vector<4x64xf32> -> vector<4x64xf32>
    %cst_72 = arith.constant dense<0.000000e+00> : vector<4x64xf32>
    %83 = tpu.matmul %11, %81, %cst_72 {dimension_numbers = #tpu.dot_dimension_numbers<[1], [0], [0], [1], [0, 0, 1, 1], [], []>} : vector<4x8xf32>, vector<8x64xf32>, vector<4x64xf32> -> vector<4x64xf32>
    %84 = arith.maximumf %82, %83 : vector<4x64xf32>
    %cst_73 = arith.constant dense<0.000000e+00> : vector<4x32xf32>
    %85 = tpu.matmul %84, %13, %cst_73 {dimension_numbers = #tpu.dot_dimension_numbers<[1], [0], [0], [1], [0, 0, 1, 1], [], []>} : vector<4x64xf32>, vector<64x32xf32>, vector<4x32xf32> -> vector<4x32xf32>
    %cst_74 = arith.constant dense<0.000000e+00> : vector<4x32xf32>
    %86 = tpu.matmul %84, %15, %cst_74 {dimension_numbers = #tpu.dot_dimension_numbers<[1], [0], [0], [1], [0, 0, 1, 1], [], []>} : vector<4x64xf32>, vector<64x32xf32>, vector<4x32xf32> -> vector<4x32xf32>
    %87 = arith.maximumf %85, %86 : vector<4x32xf32>
    %c0_75 = arith.constant 0 : index
    %c0_76 = arith.constant 0 : index
    %88 = vector.load %arg10[%c0_75, %c0_76] : memref<1x70xf32, #tpu.memory_space<vmem>>, vector<1x70xf32>
    %89 = vector.extract_strided_slice %87 {offsets = [0, 0], sizes = [1, 32], strides = [1, 1]} : vector<4x32xf32> to vector<1x32xf32>
    %c0_77 = arith.constant 0 : index
    %c0_78 = arith.constant 0 : index
    %c0_79 = arith.constant 0 : index
    %90 = vector.load %arg9[%c0_77, %c0_78, %c0_79] : memref<4x32x70xf32, #tpu.memory_space<vmem>>, vector<1x32x70xf32>
    %91 = vector.shape_cast %90 : vector<1x32x70xf32> to vector<32x70xf32>
    %cst_80 = arith.constant dense<0.000000e+00> : vector<1x70xf32>
    %92 = tpu.matmul %89, %91, %cst_80 {dimension_numbers = #tpu.dot_dimension_numbers<[1], [0], [0], [1], [0, 0, 1, 1], [], []>} : vector<1x32xf32>, vector<32x70xf32>, vector<1x70xf32> -> vector<1x70xf32>
    %93 = arith.addf %88, %92 : vector<1x70xf32>
    %94 = vector.extract_strided_slice %87 {offsets = [1, 0], sizes = [1, 32], strides = [1, 1]} : vector<4x32xf32> to vector<1x32xf32>
    %c1_81 = arith.constant 1 : index
    %c0_82 = arith.constant 0 : index
    %c0_83 = arith.constant 0 : index
    %95 = vector.load %arg9[%c1_81, %c0_82, %c0_83] : memref<4x32x70xf32, #tpu.memory_space<vmem>>, vector<1x32x70xf32>
    %96 = vector.shape_cast %95 : vector<1x32x70xf32> to vector<32x70xf32>
    %cst_84 = arith.constant dense<0.000000e+00> : vector<1x70xf32>
    %97 = tpu.matmul %94, %96, %cst_84 {dimension_numbers = #tpu.dot_dimension_numbers<[1], [0], [0], [1], [0, 0, 1, 1], [], []>} : vector<1x32xf32>, vector<32x70xf32>, vector<1x70xf32> -> vector<1x70xf32>
    %98 = arith.addf %93, %97 : vector<1x70xf32>
    %99 = vector.extract_strided_slice %87 {offsets = [2, 0], sizes = [1, 32], strides = [1, 1]} : vector<4x32xf32> to vector<1x32xf32>
    %c2_85 = arith.constant 2 : index
    %c0_86 = arith.constant 0 : index
    %c0_87 = arith.constant 0 : index
    %100 = vector.load %arg9[%c2_85, %c0_86, %c0_87] : memref<4x32x70xf32, #tpu.memory_space<vmem>>, vector<1x32x70xf32>
    %101 = vector.shape_cast %100 : vector<1x32x70xf32> to vector<32x70xf32>
    %cst_88 = arith.constant dense<0.000000e+00> : vector<1x70xf32>
    %102 = tpu.matmul %99, %101, %cst_88 {dimension_numbers = #tpu.dot_dimension_numbers<[1], [0], [0], [1], [0, 0, 1, 1], [], []>} : vector<1x32xf32>, vector<32x70xf32>, vector<1x70xf32> -> vector<1x70xf32>
    %103 = arith.addf %98, %102 : vector<1x70xf32>
    %104 = vector.extract_strided_slice %87 {offsets = [3, 0], sizes = [1, 32], strides = [1, 1]} : vector<4x32xf32> to vector<1x32xf32>
    %c3_89 = arith.constant 3 : index
    %c0_90 = arith.constant 0 : index
    %c0_91 = arith.constant 0 : index
    %105 = vector.load %arg9[%c3_89, %c0_90, %c0_91] : memref<4x32x70xf32, #tpu.memory_space<vmem>>, vector<1x32x70xf32>
    %106 = vector.shape_cast %105 : vector<1x32x70xf32> to vector<32x70xf32>
    %cst_92 = arith.constant dense<0.000000e+00> : vector<1x70xf32>
    %107 = tpu.matmul %104, %106, %cst_92 {dimension_numbers = #tpu.dot_dimension_numbers<[1], [0], [0], [1], [0, 0, 1, 1], [], []>} : vector<1x32xf32>, vector<32x70xf32>, vector<1x70xf32> -> vector<1x70xf32>
    %108 = arith.addf %103, %107 : vector<1x70xf32>
    %c1_93 = arith.constant 1 : index
    %c0_94 = arith.constant 0 : index
    %c0_95 = arith.constant 0 : index
    %109 = vector.load %arg0[%c1_93, %c0_94, %c0_95] : memref<2x28x28xf32, #tpu.memory_space<vmem>>, vector<1x28x28xf32>
    %110 = vector.shape_cast %109 : vector<1x28x28xf32> to vector<28x28xf32>
    %c0_96 = arith.constant 0 : index
    %c0_97 = arith.constant 0 : index
    %111 = vector.load %arg2[%c0_96, %c0_97] : memref<1x72xf32, #tpu.memory_space<vmem>>, vector<1x72xf32>
    %112 = vector.extract_strided_slice %110 {offsets = [0, 0], sizes = [24, 28], strides = [1, 1]} : vector<28x28xf32> to vector<24x28xf32>
    %c0_98 = arith.constant 0 : index
    %c0_99 = arith.constant 0 : index
    %c0_100 = arith.constant 0 : index
    %113 = vector.load %arg1[%c0_98, %c0_99, %c0_100] : memref<5x28x72xf32, #tpu.memory_space<vmem>>, vector<1x28x72xf32>
    %114 = vector.shape_cast %113 : vector<1x28x72xf32> to vector<28x72xf32>
    %cst_101 = arith.constant dense<0.000000e+00> : vector<24x72xf32>
    %115 = tpu.matmul %112, %114, %cst_101 {dimension_numbers = #tpu.dot_dimension_numbers<[1], [0], [0], [1], [0, 0, 1, 1], [], []>} : vector<24x28xf32>, vector<28x72xf32>, vector<24x72xf32> -> vector<24x72xf32>
    %116 = vector.broadcast %111 : vector<1x72xf32> to vector<24x72xf32>
    %117 = arith.addf %116, %115 : vector<24x72xf32>
    %118 = vector.extract_strided_slice %110 {offsets = [1, 0], sizes = [24, 28], strides = [1, 1]} : vector<28x28xf32> to vector<24x28xf32>
    %c1_102 = arith.constant 1 : index
    %c0_103 = arith.constant 0 : index
    %c0_104 = arith.constant 0 : index
    %119 = vector.load %arg1[%c1_102, %c0_103, %c0_104] : memref<5x28x72xf32, #tpu.memory_space<vmem>>, vector<1x28x72xf32>
    %120 = vector.shape_cast %119 : vector<1x28x72xf32> to vector<28x72xf32>
    %cst_105 = arith.constant dense<0.000000e+00> : vector<24x72xf32>
    %121 = tpu.matmul %118, %120, %cst_105 {dimension_numbers = #tpu.dot_dimension_numbers<[1], [0], [0], [1], [0, 0, 1, 1], [], []>} : vector<24x28xf32>, vector<28x72xf32>, vector<24x72xf32> -> vector<24x72xf32>
    %122 = arith.addf %117, %121 : vector<24x72xf32>
    %123 = vector.extract_strided_slice %110 {offsets = [2, 0], sizes = [24, 28], strides = [1, 1]} : vector<28x28xf32> to vector<24x28xf32>
    %c2_106 = arith.constant 2 : index
    %c0_107 = arith.constant 0 : index
    %c0_108 = arith.constant 0 : index
    %124 = vector.load %arg1[%c2_106, %c0_107, %c0_108] : memref<5x28x72xf32, #tpu.memory_space<vmem>>, vector<1x28x72xf32>
    %125 = vector.shape_cast %124 : vector<1x28x72xf32> to vector<28x72xf32>
    %cst_109 = arith.constant dense<0.000000e+00> : vector<24x72xf32>
    %126 = tpu.matmul %123, %125, %cst_109 {dimension_numbers = #tpu.dot_dimension_numbers<[1], [0], [0], [1], [0, 0, 1, 1], [], []>} : vector<24x28xf32>, vector<28x72xf32>, vector<24x72xf32> -> vector<24x72xf32>
    %127 = arith.addf %122, %126 : vector<24x72xf32>
    %128 = vector.extract_strided_slice %110 {offsets = [3, 0], sizes = [24, 28], strides = [1, 1]} : vector<28x28xf32> to vector<24x28xf32>
    %c3_110 = arith.constant 3 : index
    %c0_111 = arith.constant 0 : index
    %c0_112 = arith.constant 0 : index
    %129 = vector.load %arg1[%c3_110, %c0_111, %c0_112] : memref<5x28x72xf32, #tpu.memory_space<vmem>>, vector<1x28x72xf32>
    %130 = vector.shape_cast %129 : vector<1x28x72xf32> to vector<28x72xf32>
    %cst_113 = arith.constant dense<0.000000e+00> : vector<24x72xf32>
    %131 = tpu.matmul %128, %130, %cst_113 {dimension_numbers = #tpu.dot_dimension_numbers<[1], [0], [0], [1], [0, 0, 1, 1], [], []>} : vector<24x28xf32>, vector<28x72xf32>, vector<24x72xf32> -> vector<24x72xf32>
    %132 = arith.addf %127, %131 : vector<24x72xf32>
    %133 = vector.extract_strided_slice %110 {offsets = [4, 0], sizes = [24, 28], strides = [1, 1]} : vector<28x28xf32> to vector<24x28xf32>
    %c4_114 = arith.constant 4 : index
    %c0_115 = arith.constant 0 : index
    %c0_116 = arith.constant 0 : index
    %134 = vector.load %arg1[%c4_114, %c0_115, %c0_116] : memref<5x28x72xf32, #tpu.memory_space<vmem>>, vector<1x28x72xf32>
    %135 = vector.shape_cast %134 : vector<1x28x72xf32> to vector<28x72xf32>
    %cst_117 = arith.constant dense<0.000000e+00> : vector<24x72xf32>
    %136 = tpu.matmul %133, %135, %cst_117 {dimension_numbers = #tpu.dot_dimension_numbers<[1], [0], [0], [1], [0, 0, 1, 1], [], []>} : vector<24x28xf32>, vector<28x72xf32>, vector<24x72xf32> -> vector<24x72xf32>
    %137 = arith.addf %132, %136 : vector<24x72xf32>
    %cst_118 = arith.constant 0.000000e+00 : f32
    %138 = vector.broadcast %cst_118 : f32 to vector<24x72xf32>
    %139 = arith.maximumf %137, %138 : vector<24x72xf32>
    %cst_119 = arith.constant dense<0.000000e+00> : vector<12x72xf32>
    %140 = tpu.matmul %1, %139, %cst_119 {dimension_numbers = #tpu.dot_dimension_numbers<[1], [0], [0], [1], [0, 0, 1, 1], [], []>} : vector<12x24xf32>, vector<24x72xf32>, vector<12x72xf32> -> vector<12x72xf32>
    %cst_120 = arith.constant dense<0.000000e+00> : vector<12x72xf32>
    %141 = tpu.matmul %3, %139, %cst_120 {dimension_numbers = #tpu.dot_dimension_numbers<[1], [0], [0], [1], [0, 0, 1, 1], [], []>} : vector<12x24xf32>, vector<24x72xf32>, vector<12x72xf32> -> vector<12x72xf32>
    %142 = arith.maximumf %140, %141 : vector<12x72xf32>
    %cst_121 = arith.constant dense<0.000000e+00> : vector<12x36xf32>
    %143 = tpu.matmul %142, %5, %cst_121 {dimension_numbers = #tpu.dot_dimension_numbers<[1], [0], [0], [1], [0, 0, 1, 1], [], []>} : vector<12x72xf32>, vector<72x36xf32>, vector<12x36xf32> -> vector<12x36xf32>
    %cst_122 = arith.constant dense<0.000000e+00> : vector<12x36xf32>
    %144 = tpu.matmul %142, %7, %cst_122 {dimension_numbers = #tpu.dot_dimension_numbers<[1], [0], [0], [1], [0, 0, 1, 1], [], []>} : vector<12x72xf32>, vector<72x36xf32>, vector<12x36xf32> -> vector<12x36xf32>
    %145 = arith.maximumf %143, %144 : vector<12x36xf32>
    %c0_123 = arith.constant 0 : index
    %c0_124 = arith.constant 0 : index
    %146 = vector.load %arg4[%c0_123, %c0_124] : memref<1x64xf32, #tpu.memory_space<vmem>>, vector<1x64xf32>
    %147 = vector.extract_strided_slice %145 {offsets = [0, 0], sizes = [8, 36], strides = [1, 1]} : vector<12x36xf32> to vector<8x36xf32>
    %c0_125 = arith.constant 0 : index
    %c0_126 = arith.constant 0 : index
    %c0_127 = arith.constant 0 : index
    %148 = vector.load %arg3[%c0_125, %c0_126, %c0_127] : memref<5x36x64xf32, #tpu.memory_space<vmem>>, vector<1x36x64xf32>
    %149 = vector.shape_cast %148 : vector<1x36x64xf32> to vector<36x64xf32>
    %cst_128 = arith.constant dense<0.000000e+00> : vector<8x64xf32>
    %150 = tpu.matmul %147, %149, %cst_128 {dimension_numbers = #tpu.dot_dimension_numbers<[1], [0], [0], [1], [0, 0, 1, 1], [], []>} : vector<8x36xf32>, vector<36x64xf32>, vector<8x64xf32> -> vector<8x64xf32>
    %151 = vector.broadcast %146 : vector<1x64xf32> to vector<8x64xf32>
    %152 = arith.addf %151, %150 : vector<8x64xf32>
    %153 = vector.extract_strided_slice %145 {offsets = [1, 0], sizes = [8, 36], strides = [1, 1]} : vector<12x36xf32> to vector<8x36xf32>
    %c1_129 = arith.constant 1 : index
    %c0_130 = arith.constant 0 : index
    %c0_131 = arith.constant 0 : index
    %154 = vector.load %arg3[%c1_129, %c0_130, %c0_131] : memref<5x36x64xf32, #tpu.memory_space<vmem>>, vector<1x36x64xf32>
    %155 = vector.shape_cast %154 : vector<1x36x64xf32> to vector<36x64xf32>
    %cst_132 = arith.constant dense<0.000000e+00> : vector<8x64xf32>
    %156 = tpu.matmul %153, %155, %cst_132 {dimension_numbers = #tpu.dot_dimension_numbers<[1], [0], [0], [1], [0, 0, 1, 1], [], []>} : vector<8x36xf32>, vector<36x64xf32>, vector<8x64xf32> -> vector<8x64xf32>
    %157 = arith.addf %152, %156 : vector<8x64xf32>
    %158 = vector.extract_strided_slice %145 {offsets = [2, 0], sizes = [8, 36], strides = [1, 1]} : vector<12x36xf32> to vector<8x36xf32>
    %c2_133 = arith.constant 2 : index
    %c0_134 = arith.constant 0 : index
    %c0_135 = arith.constant 0 : index
    %159 = vector.load %arg3[%c2_133, %c0_134, %c0_135] : memref<5x36x64xf32, #tpu.memory_space<vmem>>, vector<1x36x64xf32>
    %160 = vector.shape_cast %159 : vector<1x36x64xf32> to vector<36x64xf32>
    %cst_136 = arith.constant dense<0.000000e+00> : vector<8x64xf32>
    %161 = tpu.matmul %158, %160, %cst_136 {dimension_numbers = #tpu.dot_dimension_numbers<[1], [0], [0], [1], [0, 0, 1, 1], [], []>} : vector<8x36xf32>, vector<36x64xf32>, vector<8x64xf32> -> vector<8x64xf32>
    %162 = arith.addf %157, %161 : vector<8x64xf32>
    %163 = vector.extract_strided_slice %145 {offsets = [3, 0], sizes = [8, 36], strides = [1, 1]} : vector<12x36xf32> to vector<8x36xf32>
    %c3_137 = arith.constant 3 : index
    %c0_138 = arith.constant 0 : index
    %c0_139 = arith.constant 0 : index
    %164 = vector.load %arg3[%c3_137, %c0_138, %c0_139] : memref<5x36x64xf32, #tpu.memory_space<vmem>>, vector<1x36x64xf32>
    %165 = vector.shape_cast %164 : vector<1x36x64xf32> to vector<36x64xf32>
    %cst_140 = arith.constant dense<0.000000e+00> : vector<8x64xf32>
    %166 = tpu.matmul %163, %165, %cst_140 {dimension_numbers = #tpu.dot_dimension_numbers<[1], [0], [0], [1], [0, 0, 1, 1], [], []>} : vector<8x36xf32>, vector<36x64xf32>, vector<8x64xf32> -> vector<8x64xf32>
    %167 = arith.addf %162, %166 : vector<8x64xf32>
    %168 = vector.extract_strided_slice %145 {offsets = [4, 0], sizes = [8, 36], strides = [1, 1]} : vector<12x36xf32> to vector<8x36xf32>
    %c4_141 = arith.constant 4 : index
    %c0_142 = arith.constant 0 : index
    %c0_143 = arith.constant 0 : index
    %169 = vector.load %arg3[%c4_141, %c0_142, %c0_143] : memref<5x36x64xf32, #tpu.memory_space<vmem>>, vector<1x36x64xf32>
    %170 = vector.shape_cast %169 : vector<1x36x64xf32> to vector<36x64xf32>
    %cst_144 = arith.constant dense<0.000000e+00> : vector<8x64xf32>
    %171 = tpu.matmul %168, %170, %cst_144 {dimension_numbers = #tpu.dot_dimension_numbers<[1], [0], [0], [1], [0, 0, 1, 1], [], []>} : vector<8x36xf32>, vector<36x64xf32>, vector<8x64xf32> -> vector<8x64xf32>
    %172 = arith.addf %167, %171 : vector<8x64xf32>
    %cst_145 = arith.constant 0.000000e+00 : f32
    %173 = vector.broadcast %cst_145 : f32 to vector<8x64xf32>
    %174 = arith.maximumf %172, %173 : vector<8x64xf32>
    %cst_146 = arith.constant dense<0.000000e+00> : vector<4x64xf32>
    %175 = tpu.matmul %9, %174, %cst_146 {dimension_numbers = #tpu.dot_dimension_numbers<[1], [0], [0], [1], [0, 0, 1, 1], [], []>} : vector<4x8xf32>, vector<8x64xf32>, vector<4x64xf32> -> vector<4x64xf32>
    %cst_147 = arith.constant dense<0.000000e+00> : vector<4x64xf32>
    %176 = tpu.matmul %11, %174, %cst_147 {dimension_numbers = #tpu.dot_dimension_numbers<[1], [0], [0], [1], [0, 0, 1, 1], [], []>} : vector<4x8xf32>, vector<8x64xf32>, vector<4x64xf32> -> vector<4x64xf32>
    %177 = arith.maximumf %175, %176 : vector<4x64xf32>
    %cst_148 = arith.constant dense<0.000000e+00> : vector<4x32xf32>
    %178 = tpu.matmul %177, %13, %cst_148 {dimension_numbers = #tpu.dot_dimension_numbers<[1], [0], [0], [1], [0, 0, 1, 1], [], []>} : vector<4x64xf32>, vector<64x32xf32>, vector<4x32xf32> -> vector<4x32xf32>
    %cst_149 = arith.constant dense<0.000000e+00> : vector<4x32xf32>
    %179 = tpu.matmul %177, %15, %cst_149 {dimension_numbers = #tpu.dot_dimension_numbers<[1], [0], [0], [1], [0, 0, 1, 1], [], []>} : vector<4x64xf32>, vector<64x32xf32>, vector<4x32xf32> -> vector<4x32xf32>
    %180 = arith.maximumf %178, %179 : vector<4x32xf32>
    %c0_150 = arith.constant 0 : index
    %c0_151 = arith.constant 0 : index
    %181 = vector.load %arg10[%c0_150, %c0_151] : memref<1x70xf32, #tpu.memory_space<vmem>>, vector<1x70xf32>
    %182 = vector.extract_strided_slice %180 {offsets = [0, 0], sizes = [1, 32], strides = [1, 1]} : vector<4x32xf32> to vector<1x32xf32>
    %c0_152 = arith.constant 0 : index
    %c0_153 = arith.constant 0 : index
    %c0_154 = arith.constant 0 : index
    %183 = vector.load %arg9[%c0_152, %c0_153, %c0_154] : memref<4x32x70xf32, #tpu.memory_space<vmem>>, vector<1x32x70xf32>
    %184 = vector.shape_cast %183 : vector<1x32x70xf32> to vector<32x70xf32>
    %cst_155 = arith.constant dense<0.000000e+00> : vector<1x70xf32>
    %185 = tpu.matmul %182, %184, %cst_155 {dimension_numbers = #tpu.dot_dimension_numbers<[1], [0], [0], [1], [0, 0, 1, 1], [], []>} : vector<1x32xf32>, vector<32x70xf32>, vector<1x70xf32> -> vector<1x70xf32>
    %186 = arith.addf %181, %185 : vector<1x70xf32>
    %187 = vector.extract_strided_slice %180 {offsets = [1, 0], sizes = [1, 32], strides = [1, 1]} : vector<4x32xf32> to vector<1x32xf32>
    %c1_156 = arith.constant 1 : index
    %c0_157 = arith.constant 0 : index
    %c0_158 = arith.constant 0 : index
    %188 = vector.load %arg9[%c1_156, %c0_157, %c0_158] : memref<4x32x70xf32, #tpu.memory_space<vmem>>, vector<1x32x70xf32>
    %189 = vector.shape_cast %188 : vector<1x32x70xf32> to vector<32x70xf32>
    %cst_159 = arith.constant dense<0.000000e+00> : vector<1x70xf32>
    %190 = tpu.matmul %187, %189, %cst_159 {dimension_numbers = #tpu.dot_dimension_numbers<[1], [0], [0], [1], [0, 0, 1, 1], [], []>} : vector<1x32xf32>, vector<32x70xf32>, vector<1x70xf32> -> vector<1x70xf32>
    %191 = arith.addf %186, %190 : vector<1x70xf32>
    %192 = vector.extract_strided_slice %180 {offsets = [2, 0], sizes = [1, 32], strides = [1, 1]} : vector<4x32xf32> to vector<1x32xf32>
    %c2_160 = arith.constant 2 : index
    %c0_161 = arith.constant 0 : index
    %c0_162 = arith.constant 0 : index
    %193 = vector.load %arg9[%c2_160, %c0_161, %c0_162] : memref<4x32x70xf32, #tpu.memory_space<vmem>>, vector<1x32x70xf32>
    %194 = vector.shape_cast %193 : vector<1x32x70xf32> to vector<32x70xf32>
    %cst_163 = arith.constant dense<0.000000e+00> : vector<1x70xf32>
    %195 = tpu.matmul %192, %194, %cst_163 {dimension_numbers = #tpu.dot_dimension_numbers<[1], [0], [0], [1], [0, 0, 1, 1], [], []>} : vector<1x32xf32>, vector<32x70xf32>, vector<1x70xf32> -> vector<1x70xf32>
    %196 = arith.addf %191, %195 : vector<1x70xf32>
    %197 = vector.extract_strided_slice %180 {offsets = [3, 0], sizes = [1, 32], strides = [1, 1]} : vector<4x32xf32> to vector<1x32xf32>
    %c3_164 = arith.constant 3 : index
    %c0_165 = arith.constant 0 : index
    %c0_166 = arith.constant 0 : index
    %198 = vector.load %arg9[%c3_164, %c0_165, %c0_166] : memref<4x32x70xf32, #tpu.memory_space<vmem>>, vector<1x32x70xf32>
    %199 = vector.shape_cast %198 : vector<1x32x70xf32> to vector<32x70xf32>
    %cst_167 = arith.constant dense<0.000000e+00> : vector<1x70xf32>
    %200 = tpu.matmul %197, %199, %cst_167 {dimension_numbers = #tpu.dot_dimension_numbers<[1], [0], [0], [1], [0, 0, 1, 1], [], []>} : vector<1x32xf32>, vector<32x70xf32>, vector<1x70xf32> -> vector<1x70xf32>
    %201 = arith.addf %196, %200 : vector<1x70xf32>
    %202 = tpu.concatenate %108, %201 in 0 : vector<1x70xf32>, vector<1x70xf32> -> vector<2x70xf32>
    %cst_168 = arith.constant 0.000000e+00 : f32
    %203 = vector.broadcast %cst_168 : f32 to vector<2x70xf32>
    %204 = arith.maximumf %202, %203 : vector<2x70xf32>
    %c0_169 = arith.constant 0 : index
    %c0_170 = arith.constant 0 : index
    %205 = vector.load %arg11[%c0_169, %c0_170] : memref<70x30xf32, #tpu.memory_space<vmem>>, vector<70x30xf32>
    %cst_171 = arith.constant dense<0.000000e+00> : vector<2x30xf32>
    %206 = tpu.matmul %204, %205, %cst_171 {dimension_numbers = #tpu.dot_dimension_numbers<[1], [0], [0], [1], [0, 0, 1, 1], [], []>} : vector<2x70xf32>, vector<70x30xf32>, vector<2x30xf32> -> vector<2x30xf32>
    %c0_172 = arith.constant 0 : index
    %c0_173 = arith.constant 0 : index
    %207 = vector.load %arg12[%c0_172, %c0_173] : memref<1x30xf32, #tpu.memory_space<vmem>>, vector<1x30xf32>
    %208 = vector.broadcast %207 : vector<1x30xf32> to vector<2x30xf32>
    %209 = arith.addf %206, %208 : vector<2x30xf32>
    %cst_174 = arith.constant 0.000000e+00 : f32
    %210 = vector.broadcast %cst_174 : f32 to vector<2x30xf32>
    %211 = arith.maximumf %209, %210 : vector<2x30xf32>
    %c0_175 = arith.constant 0 : index
    %c0_176 = arith.constant 0 : index
    %212 = vector.load %arg13[%c0_175, %c0_176] : memref<30x10xf32, #tpu.memory_space<vmem>>, vector<30x10xf32>
    %cst_177 = arith.constant dense<0.000000e+00> : vector<2x10xf32>
    %213 = tpu.matmul %211, %212, %cst_177 {dimension_numbers = #tpu.dot_dimension_numbers<[1], [0], [0], [1], [0, 0, 1, 1], [], []>} : vector<2x30xf32>, vector<30x10xf32>, vector<2x10xf32> -> vector<2x10xf32>
    %c0_178 = arith.constant 0 : index
    %c0_179 = arith.constant 0 : index
    %214 = vector.load %arg14[%c0_178, %c0_179] : memref<1x10xf32, #tpu.memory_space<vmem>>, vector<1x10xf32>
    %215 = vector.broadcast %214 : vector<1x10xf32> to vector<2x10xf32>
    %216 = arith.addf %213, %215 : vector<2x10xf32>
    %c0_180 = arith.constant 0 : index
    %c0_181 = arith.constant 0 : index
    %217 = vector.load %arg15[%c0_180, %c0_181] : memref<2x10xf32, #tpu.memory_space<vmem>>, vector<2x10xf32>
    tpu.vector_store %arg15[%c0_180, %c0_181], %216 {strides = array<i32>} : memref<2x10xf32, #tpu.memory_space<vmem>>, vector<2x10xf32>,
    return
  }
}

</mosaic_0001>

<bundles_post_ra>
// kernel: convnet_forward.1
= control target key start
LH: loop header
LB: loop body
LE: loop exit
PB: predicated region body
PF: predicated region fallthrough
CT: control target
= control target key end

     0   :  { %vm114_vm0 = vcmask 1043456   ;;  %v5500_v3 = vmov 0.0|0.0   ;;  %vm5501_vm1 = vmmov 0   ;;  %v5502_v6 = vmov 0.0   ;;  %s6641_s0 = inlined_call_operand.vmem [shape: f32[2,28,28], index: 0, kind: input, shape index: {}]   ;;  %s6642_s1 = inlined_call_operand.vmem [shape: f32[5,28,72], index: 1, kind: input, shape index: {}]   ;;  %s6643_s2 = inlined_call_operand.vmem [shape: f32[1,72], index: 2, kind: input, shape index: {}]   ;;  %s6644_s3 = inlined_call_operand.vmem [shape: f32[5,36,64], index: 3, kind: input, shape index: {}]   ;;  %s6645_s4 = inlined_call_operand.vmem [shape: f32[1,64], index: 4, kind: input, shape index: {}]   ;;  %s6646_s5 = inlined_call_operand.vmem [shape: f32[2,12,24], index: 5, kind: input, shape index: {}]   ;;  %s6647_s6 = inlined_call_operand.vmem [shape: f32[2,72,36], index: 6, kind: input, shape index: {}]   ;;  %s6648_s7 = inlined_call_operand.vmem [shape: f32[2,4,8], index: 7, kind: input, shape index: {}]   ;;  %s6649_s8 = inlined_call_operand.vmem [shape: f32[2,64,32], index: 8, kind: input, shape index: {}]   ;;  %s6650_s9 = inlined_call_operand.vmem [shape: f32[4,32,70], index: 9, kind: input, shape index: {}]   ;;  %s6651_s10 = inlined_call_operand.vmem [shape: f32[1,70], index: 10, kind: input, shape index: {}]   ;;  %s6652_s11 = inlined_call_operand.vmem [shape: f32[70,30], index: 11, kind: input, shape index: {}]   ;;  %s6653_s12 = inlined_call_operand.vmem [shape: f32[1,30], index: 12, kind: input, shape index: {}]   ;;  %s6654_s13 = inlined_call_operand.vmem [shape: f32[30,10], index: 13, kind: input, shape index: {}]   ;;  %s6655_s14 = inlined_call_operand.vmem [shape: f32[1,10], index: 14, kind: input, shape index: {}]   ;;  %s6656_s15 = inlined_call_operand.hbm [shape: f32[2,10], index: 15, kind: output, shape index: {}]  }
   0x1   :  { %v100_v0 = vld [vmem:[%s6642_s1] sm:$0xff]  ;;  %v101_v1 = vld [vmem:[%s6642_s1 + $0x8] sm:$0xff]  ;;  %v102_v2 = vld [vmem:[%s6642_s1 + $0x10] sm:$0xff]  ;;  %5060 = vmatprep.subr.bf16.mxu0 %v5500_v3  ;;  %4432 = vmatprep.mubr.msk.f32.mxu0 %vm5501_vm1, %v5502_v6  ;;  %vm5503_vm2 = vmmov 1   ;;  %vm104_vm4 = vcmask 228352  }
   0x2   :  { %v5595_v4 = vpack.c.bf16 %v101_v1, %v100_v0  ;;  %v103_v5 = vld [vmem:[%s6642_s1 + $0x18] sm:$0xf]  ;;  %vm5608_vm3 = vmpackc.low %vm114_vm0, %vm5503_vm2  ;;  %v3984_v9 = vld [vmem:[%s6642_s1 + $0x20] sm:$0xff] }
   0x3   :  { %v5603_v7 = vpack.c.bf16 %v103_v5, %v102_v2  ;;  %v3985_v10 = vld [vmem:[%s6642_s1 + $0x28] sm:$0xff]  ;;  %v5624_v11 = vld [vmem:[%s6641_s0] sm:$0xff]  ;;  %v3986_v13 = vld [vmem:[%s6642_s1 + $0x30] sm:$0xff] }
   0x4   :  { %5062 = vmatpush3.bf16.msra.mxu0 %v5595_v4  ;;  %v5626_v12 = vpack.c.bf16 %v3985_v10, %v3984_v9  ;;  %v3987_v14 = vld [vmem:[%s6642_s1 + $0x38] sm:$0xf] }
   0x5   :  { %5063 = vmatprep.subr.bf16.mxu0 %v5500_v3 }
   0x8   :  { %5066 = vmatpush3.bf16.msk.msra.mxu0 %vm5608_vm3, %v5603_v7 }
   0x9   :  { %5067 = vmatprep.subr.bf16.mxu0 %v5500_v3 }
   0xa   :  { %20 = vsyncpa [#allocation3], 0  ;;  %v5642_v15 = vld [vmem:[%s6641_s0 + $0x8] sm:$0xff]  ;;  %v5645_v16 = vpack.c.bf16 %v3987_v14, %v3986_v13  ;;  %v214_v17 = vrot.slane %v5624_v11, 1  ;;  %v5657_v19 = vld [vmem:[%s6641_s0 + $0x10] sm:$0xff]  ;;  %vm213_vm5 = vcmask 1046528  }
   0xb   :  { %4433 = vmatmul.mubr.msk.f32.vlgmr.msra.gmra.mrb[0].mxu0 %vm104_vm4, %v5624_v11  ;;  %v215_v18 = vrot.slane %v5642_v15, 1  ;;  %v3992_v20 = vld [vmem:[%s6642_s1 + $0x40] sm:$0xff]  ;;  %v3993_v21 = vld [vmem:[%s6642_s1 + $0x48] sm:$0xff]  ;;  %v217_v23 = vrot.slane %v5657_v19, 1  ;;  %v5680_v25 = vld [vmem:[%s6641_s0 + $0x18] sm:$0xf] }
   0xc   :  { %4435 = vmatprep.mubr.msk.f32.mxu0 %vm5501_vm1, %v5502_v6  ;;  %5069 = vmatpush3.bf16.msra.mxu0 %v5626_v12  ;;  %v5675_v24 = vpack.c.bf16 %v3993_v21, %v3992_v20  ;;  %v3994_v26 = vld [vmem:[%s6642_s1 + $0x50] sm:$0xff]  ;;  %v3995_v27 = vld [vmem:[%s6642_s1 + $0x58] sm:$0xf]  ;;  %v219_v29 = vrot.slane %v5680_v25, 1  ;;  %v319_v31 = vrot.slane %v5624_v11, 2  ;;  %v320_v32 = vrot.slane %v5642_v15, 2 }
   0xd   :  { %5070 = vmatprep.subr.bf16.mxu0 %v5500_v3  ;;  %v216_v22 = vsel %vm213_vm5, %v214_v17, %v215_v18  ;;  %v218_v28 = vsel %vm213_vm5, %v215_v18, %v217_v23  ;;  %v5694_v30 = vpack.c.bf16 %v3995_v27, %v3994_v26  ;;  %vm318_vm6 = vcmask 1045504   ;;  %v4000_v34 = vld [vmem:[%s6642_s1 + $0x60] sm:$0xff]  ;;  %v4001_v35 = vld [vmem:[%s6642_s1 + $0x68] sm:$0xff]  ;;  %v4002_v39 = vld [vmem:[%s6642_s1 + $0x70] sm:$0xff] }
   0xe   :  { %v220_v33 = vsel %vm213_vm5, %v217_v23, %v219_v29  ;;  %v321_v36 = vsel %vm318_vm6, %v319_v31, %v320_v32  ;;  %v322_v37 = vrot.slane %v5657_v19, 2  ;;  %v5718_v38 = vpack.c.bf16 %v4001_v35, %v4000_v34  ;;  %v4003_v40 = vld [vmem:[%s6642_s1 + $0x78] sm:$0xf]  ;;  %v4008_v47 = vld [vmem:[%s6642_s1 + $0x80] sm:$0xff]  ;;  %v4009_v48 = vld [vmem:[%s6642_s1 + $0x88] sm:$0xff] }
   0xf   :  { %4436 = vmatmul.mubr.msk.f32.gmra.mrb[2].mxu0 %vm104_vm4, %v5642_v15  ;;  %v324_v42 = vrot.slane %v5680_v25, 2  ;;  %v5732_v43 = vpack.c.bf16 %v4003_v40, %v4002_v39  ;;  %v424_v44 = vrot.slane %v5624_v11, 3  ;;  %v425_v45 = vrot.slane %v5642_v15, 3  ;;  %v4010_v52 = vld [vmem:[%s6642_s1 + $0x90] sm:$0xff]  ;;  %v4011_v53 = vld [vmem:[%s6642_s1 + $0x98] sm:$0xf] }
  0x10   :  { %4438 = vmatprep.mubr.msk.f32.mxu0 %vm5501_vm1, %v5502_v6  ;;  %5073 = vmatpush3.bf16.msk.msra.mxu0 %vm5608_vm3, %v5645_v16  ;;  %v323_v41 = vsel %vm318_vm6, %v320_v32, %v322_v37  ;;  %vm423_vm7 = vcmask 1044480   ;;  %v427_v50 = vrot.slane %v5657_v19, 3  ;;  %v5756_v51 = vpack.c.bf16 %v4009_v48, %v4008_v47  ;;  %v5803_v1 = vld [vmem:[%s6646_s5] sm:$0xff]  ;;  %v5818_v23 = vld [vmem:[%s6646_s5 + $0x8] sm:$0xf]  ;;  %v59_v29 = vld [vmem:[%s6647_s6 + $0x18] sm:$0xff] }
  0x11   :  { %5074 = vmatprep.subr.bf16.mxu0 %v5500_v3  ;;  %v325_v46 = vsel %vm318_vm6, %v322_v37, %v324_v42  ;;  %v426_v49 = vsel %vm423_vm7, %v424_v44, %v425_v45  ;;  %v429_v55 = vrot.slane %v5680_v25, 3  ;;  %v5770_v56 = vpack.c.bf16 %v4011_v53, %v4010_v52  ;;  %v5810_v2 = vld [vmem:[%s6643_s2] ss:$0 sm:$0xff]  ;;  %v57_v27 = vld [vmem:[%s6647_s6 + $0x8] sm:$0xff]  ;;  %v5846_v32 = vld [vmem:[%s6646_s5 + $0x18] sm:$0xf] }
  0x12   :  { %v428_v54 = vsel %vm423_vm7, %v425_v45, %v427_v50  ;;  %v528_v57 = vrot.slane %v5624_v11, 4  ;;  %v529_v58 = vrot.slane %v5642_v15, 4  ;;  %v531_v61 = vrot.slane %v5657_v19, 4  ;;  %v56_v26 = vld [vmem:[%s6647_s6] sm:$0xff]  ;;  %v61_v35 = vld [vmem:[%s6647_s6 + $0x28] sm:$0xff]  ;;  %v62_v37 = vld [vmem:[%s6647_s6 + $0x30] sm:$0xff] }
  0x13   :  { %4439 = vmatmul.mubr.msk.f32.gmra.mrb[4].mxu0 %vm104_vm4, %v5657_v19  ;;  %v430_v59 = vsel %vm423_vm7, %v427_v50, %v429_v55  ;;  %v533_v63 = vrot.slane %v5680_v25, 4  ;;  %vm630_vm8 = vcmask 195584   ;;  %v5823_v25 = vld [vmem:[%s6646_s5 + $0x10] sm:$0xff]  ;;  %v5841_v31 = vpack.c.bf16 %v57_v27, %v56_v26  ;;  %v60_v34 = vld [vmem:[%s6647_s6 + $0x20] sm:$0xff]  ;;  %v63_v39 = vld [vmem:[%s6647_s6 + $0x38] sm:$0xff] }
  0x14   :  { %4449 = vmatprep.mubr.msk.f32.mxu0 %vm5501_vm1, %v5502_v6  ;;  %v530_v60 = vsel %vm114_vm0, %v528_v57, %v529_v58  ;;  %v532_v62 = vsel %vm114_vm0, %v529_v58, %v531_v61  ;;  %4515 = vmatprep.mubr.msk.f32.mxu1 %vm630_vm8, %v5803_v1  ;;  %v5872_v40 = vpack.c.bf16 %v63_v39, %v62_v37  ;;  %v3961_v42 = vld [vmem:[%s6647_s6 + $0x48] sm:$0xff]  ;;  %v3962_v44 = vld [vmem:[%s6647_s6 + $0x50] sm:$0xff]  ;;  %v3964_v50 = vld [vmem:[%s6647_s6 + $0x60] sm:$0xff]  ;;  %vm795_vm9 = vcmask 588800  }
  0x15   :  { %v534_v0 = vsel %vm114_vm0, %v531_v61, %v533_v63  ;;  %v5888_v45 = vpack.c.bf16 %v3962_v44, %v3961_v42  ;;  %v3965_v57 = vld [vmem:[%s6647_s6 + $0x68] sm:$0xff]  ;;  %v3966_v58 = vld [vmem:[%s6647_s6 + $0x70] sm:$0xff]  ;;  %v3968_v61 = vld [vmem:[%s6647_s6 + $0x80] sm:$0xff]  ;;  %vm960_vm10 = vcmask 293888   ;;  %vm1386_vm11 = vcmask 64512  }
  0x16   :  { %v5928_v63 = vld [vmem:[%s6647_s6 + $0x88] sm:$0xff]  ;;  %vm1534_vm12 = vcmask 523264   ;;  %vm1684_vm13 = vcmask 261120   ;;  %vm3758_vm14 = vcmask 1040384   ;;  %vm3777_vm15 = vcmask 572416  }
  0x17   :  { %4450 = vmatmul.mubr.msk.f32.vlgmr.msra.gmra.mrb[0].mxu0 %vm104_vm4, %v216_v22 }
  0x18   :  { %4452 = vmatprep.mubr.msk.f32.mxu0 %vm5501_vm1, %v5502_v6  ;;  %5076 = vmatpush3.bf16.msra.mxu0 %v5675_v24 }
  0x19   :  { %5077 = vmatprep.subr.bf16.mxu0 %v5500_v3 }
  0x1b   :  { %4453 = vmatmul.mubr.msk.f32.gmra.mrb[2].mxu0 %vm104_vm4, %v218_v28  ;;  %v58_v28 = vld [vmem:[%s6647_s6 + $0x10] sm:$0xff] }
  0x1c   :  { %4455 = vmatprep.mubr.msk.f32.mxu0 %vm5501_vm1, %v5502_v6  ;;  %5080 = vmatpush3.bf16.msk.msra.mxu0 %vm5608_vm3, %v5694_v30 }
  0x1d   :  { %5081 = vmatprep.subr.bf16.mxu0 %v5500_v3 }
  0x1f   :  { %4456 = vmatmul.mubr.msk.f32.gmra.mrb[4].mxu0 %vm104_vm4, %v220_v33  ;;  %v5848_v33 = vpack.c.bf16 %v59_v29, %v58_v28  ;;  %v4029_v28 = vld [vmem:[%s6644_s3 + $0x38] sm:$0xff]  ;;  %v4030_v29 = vld [vmem:[%s6644_s3 + $0x40] sm:$0xff] }
  0x20   :  { %4466 = vmatprep.mubr.msk.f32.mxu0 %vm5501_vm1, %v5502_v6 }
  0x23   :  { %4467 = vmatmul.mubr.msk.f32.vlgmr.msra.gmra.mrb[0].mxu0 %vm104_vm4, %v321_v36  ;;  %v5862_v36 = vpack.c.bf16 %v61_v35, %v60_v34 }
  0x24   :  { %4469 = vmatprep.mubr.msk.f32.mxu0 %vm5501_vm1, %v5502_v6  ;;  %5083 = vmatpush3.bf16.msra.mxu0 %v5718_v38 }
  0x25   :  { %5084 = vmatprep.subr.bf16.mxu0 %v5500_v3 }
  0x27   :  { %4470 = vmatmul.mubr.msk.f32.gmra.mrb[2].mxu0 %vm104_vm4, %v323_v41  ;;  %v5879_v41 = vld [vmem:[%s6647_s6 + $0x40] sm:$0xff] }
  0x28   :  { %4472 = vmatprep.mubr.msk.f32.mxu0 %vm5501_vm1, %v5502_v6  ;;  %5087 = vmatpush3.bf16.msk.msra.mxu0 %vm5608_vm3, %v5732_v43 }
  0x29   :  { %5088 = vmatprep.subr.bf16.mxu0 %v5500_v3 }
  0x2b   :  { %4473 = vmatmul.mubr.msk.f32.gmra.mrb[4].mxu0 %vm104_vm4, %v325_v46 }
  0x2c   :  { %4483 = vmatprep.mubr.msk.f32.mxu0 %vm5501_vm1, %v5502_v6 }
  0x2f   :  { %4484 = vmatmul.mubr.msk.f32.vlgmr.msra.gmra.mrb[0].mxu0 %vm104_vm4, %v426_v49  ;;  %v3963_v49 = vld [vmem:[%s6647_s6 + $0x58] sm:$0xff] }
  0x30   :  { %4486 = vmatprep.mubr.msk.f32.mxu0 %vm5501_vm1, %v5502_v6  ;;  %5090 = vmatpush3.bf16.msra.mxu0 %v5756_v51  ;;  %v5898_v55 = vpack.c.bf16 %v3964_v50, %v3963_v49 }
  0x31   :  { %5091 = vmatprep.subr.bf16.mxu0 %v5500_v3 }
  0x33   :  { %4487 = vmatmul.mubr.msk.f32.gmra.mrb[2].mxu0 %vm104_vm4, %v428_v54 }
  0x34   :  { %4489 = vmatprep.mubr.msk.f32.mxu0 %vm5501_vm1, %v5502_v6  ;;  %5094 = vmatpush3.bf16.msk.msra.mxu0 %vm5608_vm3, %v5770_v56 }
  0x35   :  { %4634 = vmatprep.subr.mxu0 %v5502_v6 }
  0x37   :  { %4490 = vmatmul.mubr.msk.f32.gmra.mrb[4].mxu0 %vm104_vm4, %v430_v59  ;;  %v5911_v59 = vpack.c.bf16 %v3966_v58, %v3965_v57  ;;  %v4035_v57 = vld [vmem:[%s6644_s3 + $0x58] sm:$0xff]  ;;  %v6001_v58 = vld [vmem:[%s6644_s3 + $0x48] sm:$0xf] }
  0x38   :  { %4500 = vmatprep.mubr.msk.f32.mxu0 %vm5501_vm1, %v5502_v6 }
  0x3b   :  { %4501 = vmatmul.mubr.msk.f32.vlgmr.msra.gmra.mrb[0].mxu0 %vm104_vm4, %v530_v60  ;;  %v3967_v60 = vld [vmem:[%s6647_s6 + $0x78] sm:$0xff] }
  0x3c   :  { %4503 = vmatprep.mubr.msk.f32.mxu0 %vm5501_vm1, %v5502_v6 }
  0x3f   :  { %4504 = vmatmul.mubr.msk.f32.gmra.mrb[2].mxu0 %vm104_vm4, %v532_v62  ;;  %v5921_v62 = vpack.c.bf16 %v3968_v61, %v3967_v60  ;;  %v4036_v61 = vld [vmem:[%s6644_s3 + $0x60] sm:$0xff] }
  0x40   :  { %4506 = vmatprep.mubr.msk.f32.mxu0 %vm5501_vm1, %v5502_v6 }
  0x43   :  { %4507 = vmatmul.mubr.msk.f32.gmra.mrb[4].mxu0 %vm104_vm4, %v534_v0  ;;  %v955_v0 = vld [vmem:[%s6644_s3] sm:$0xff] }
  0x44   :  { %4636 = vmatprep.mubr.msk.f32.mxu0 %vm5501_vm1, %v5502_v6 }
 0x10e   :  { %v610_v5 = vpop.f32.mrb[0].mxu0 }
 0x10f   :  { %v4502_v9 = vpop.f32.mrb[1].mxu0  ;;  %v5385_v10 = vadd.f32 %v5810_v2, %v610_v5  ;;  %v956_v5 = vld [vmem:[%s6644_s3 + $0x8] sm:$0xff] }
 0x110   :  { %v957_v9 = vld [vmem:[%s6644_s3 + $0x10] sm:$0xff] }
 0x111   :  { %v627_v15 = vmax.f32 %v5385_v10, 0.0  ;;  %v5946_v10 = vpack.c.bf16 %v956_v5, %v955_v0  ;;  %v4037_v0 = vld [vmem:[%s6644_s3 + $0x68] sm:$0xff] }
 0x112   :  { %v615_v11 = vpop.f32.mrb[2].mxu0  ;;  %v6016_v5 = vpack.c.bf16 %v4037_v0, %v4036_v61  ;;  %v81_v61 = vld [vmem:[%s6649_s8 + $0x18] sm:$0xff] }
 0x113   :  { %v5386_v13 = vadd.f32 %v5810_v2, %v615_v11  ;;  %v4505_v14 = vpop.f32.mrb[3].mxu0  ;;  %v958_v11 = vld [vmem:[%s6644_s3 + $0x18] sm:$0xff] }
 0x114   :  { %v5960_v14 = vld [vmem:[%s6644_s3 + $0x20] sm:$0xf] }
 0x115   :  { %v628_v17 = vmax.f32 %v5386_v13, 0.0  ;;  %v5952_v13 = vpack.c.bf16 %v958_v11, %v957_v9  ;;  %v4041_v9 = vld [vmem:[%s6644_s3 + $0x78] sm:$0xff]  ;;  %v4042_v11 = vld [vmem:[%s6644_s3 + $0x80] sm:$0xff] }
 0x116   :  { %v620_v18 = vpop.f32.mrb[4].mxu0 }
 0x117   :  { %v5095_v19 = vpack.c.bf16 %v628_v17, %v627_v15  ;;  %v5387_v20 = vadd.f32 %v5810_v2, %v620_v18  ;;  %v4508_v21 = vpop.f32.mrb[5].mxu0  ;;  %v4027_v18 = vld [vmem:[%s6644_s3 + $0x28] sm:$0xff] }
 0x119   :  { %v629_v22 = vmax.f32 %v5387_v20, 0.0  ;;  %5096 = vmatprep.subr.bf16.mxu1 %v5095_v19 }
 0x11a   :  { %5098 = vmatpush3.bf16.msra.mxu1 %v5095_v19 }
 0x11b   :  { %4513 = vmatprep.subr.mxu1 %v629_v22 }
 0x11e   :  { %4514 = vmatpush3.msra.mxu1 %v629_v22 }
 0x11f   :  { %4516 = vmatmul.mubr.msk.f32.vlgmr.msra.gmra.mrb[0].mxu1 %vm630_vm8, %v5818_v23  ;;  %5100 = vmatprep.subr.bf16.mxu1 %v5095_v19 }
 0x120   :  { %5102 = vmatpush3.bf16.msra.mxu1 %v5095_v19  ;;  %4524 = vmatprep.mubr.msk.f32.mxu1 %vm630_vm8, %v5823_v25  ;;  %v4028_v19 = vld [vmem:[%s6644_s3 + $0x30] sm:$0xff] }
 0x121   :  { %4522 = vmatprep.subr.mxu1 %v629_v22  ;;  %v5971_v26 = vpack.c.bf16 %v4028_v19, %v4027_v18  ;;  %v4043_v18 = vld [vmem:[%s6644_s3 + $0x88] sm:$0xff]  ;;  %v4044_v19 = vld [vmem:[%s6644_s3 + $0x90] sm:$0xff] }
 0x124   :  { %4523 = vmatpush3.msra.mxu1 %v629_v22 }
 0x125   :  { %4525 = vmatmul.mubr.msk.f32.vlgmr.msra.gmra.mrb[2].mxu1 %vm630_vm8, %v5846_v32  ;;  %5104 = vmatprep.subr.bf16.mxu1 %v5841_v31 }
 0x126   :  { %5106 = vmatpush3.bf16.msra.mxu1 %v5841_v31 }
 0x127   :  { %5108 = vmatprep.subr.bf16.mxu1 %v5848_v33 }
 0x12a   :  { %5110 = vmatpush3.bf16.msra.mxu1 %v5848_v33 }
 0x12b   :  { %5112 = vmatprep.subr.bf16.mxu1 %v5862_v36 }
 0x12e   :  { %5114 = vmatpush3.bf16.msra.mxu1 %v5862_v36 }
 0x12f   :  { %5116 = vmatprep.subr.bf16.mxu1 %v5872_v40 }
 0x132   :  { %5118 = vmatpush3.bf16.msra.mxu1 %v5872_v40 }
 0x133   :  { %4543 = vmatprep.subr.mxu1 %v5879_v41 }
 0x136   :  { %4544 = vmatpush3.msra.mxu1 %v5879_v41 }
 0x137   :  { %5120 = vmatprep.subr.bf16.mxu1 %v5888_v45 }
 0x1f2   :  { %v4517_v46 = vpop.f32.mrb[0].mxu1 }
 0x1f3   :  { %v703_v47 = vpop.f32.mrb[1].mxu1 }
 0x1f8   :  { %v4526_v48 = vpop.f32.mrb[2].mxu1 }
 0x1f9   :  { %v794_v52 = vmax.f32 %v4517_v46, %v4526_v48  ;;  %v784_v53 = vpop.f32.mrb[3].mxu1  ;;  %v5981_v48 = vpack.c.bf16 %v4030_v29, %v4029_v28  ;;  %v4050_v29 = vld [vmem:[%s6644_s3 + $0xb0] sm:$0xff] }
 0x1fa   :  { %v793_v54 = vmax.f32 %v703_v47, %v784_v53 }
 0x1fc   :  { %4545 = vmatprep.mubr.msk.f32.mxu1 %vm795_vm9, %v793_v54 }
 0x1fd   :  { %4546 = vmatmul.mubr.msk.f32.vlgmr.msra.gmra.mrb[4].mxu1 %vm795_vm9, %v794_v52 }
 0x1fe   :  { %5122 = vmatpush3.bf16.msra.mxu1 %v5888_v45  ;;  %4566 = vmatprep.mubr.msk.f32.mxu1 %vm795_vm9, %v793_v54  ;;  %v4034_v54 = vld [vmem:[%s6644_s3 + $0x50] sm:$0xff] }
 0x1ff   :  { %5124 = vmatprep.subr.bf16.mxu1 %v5898_v55  ;;  %v6003_v60 = vpack.c.bf16 %v4035_v57, %v4034_v54  ;;  %v80_v57 = vld [vmem:[%s6649_s8 + $0x10] sm:$0xff] }
 0x200   :  { %v6135_v0 = vpack.c.bf16 %v81_v61, %v80_v57  ;;  %v3974_v57 = vld [vmem:[%s6649_s8 + $0x58] sm:$0xff] }
 0x202   :  { %5126 = vmatpush3.bf16.msra.mxu1 %v5898_v55 }
 0x203   :  { %5128 = vmatprep.subr.bf16.mxu1 %v5911_v59 }
 0x206   :  { %5130 = vmatpush3.bf16.msra.mxu1 %v5911_v59 }
 0x207   :  { %5132 = vmatprep.subr.bf16.mxu1 %v5921_v62 }
 0x20a   :  { %5134 = vmatpush3.bf16.msra.mxu1 %v5921_v62 }
 0x20b   :  { %4564 = vmatprep.subr.mxu1 %v5928_v63 }
 0x20e   :  { %4565 = vmatpush3.msra.mxu1 %v5928_v63 }
 0x20f   :  { %4567 = vmatmul.mubr.msk.f32.vlgmr.msra.gmra.mrb[6].mxu1 %vm795_vm9, %v794_v52  ;;  %5135 = vmatprep.subr.bf16.mxu1 %v5500_v3 }
 0x210   :  { %4579 = vmatprep.mubr.msk.f32.mxu1 %vm5501_vm1, %v5502_v6  ;;  %5137 = vmatpush3.bf16.msra.mxu1 %v5946_v10 }
 0x211   :  { %5138 = vmatprep.subr.bf16.mxu1 %v5500_v3 }
 0x214   :  { %5140 = vmatpush3.bf16.msra.mxu1 %v5952_v13 }
 0x215   :  { %4577 = vmatprep.subr.mxu1 %v5502_v6 }
 0x218   :  { %4578 = vmatpush3.msk.msra.mxu1 %vm114_vm0, %v5960_v14 }
 0x219   :  { %5141 = vmatprep.subr.bf16.mxu1 %v5500_v3 }
 0x2d0   :  { %v4547_v15 = vpop.f32.mrb[4].mxu1 }
 0x2d1   :  { %v868_v17 = vpop.f32.mrb[5].mxu1 }
 0x2e2   :  { %v4568_v20 = vpop.f32.mrb[6].mxu1 }
 0x2e3   :  { %v953_v21 = vmax.f32 %v4547_v15, %v4568_v20  ;;  %v943_v22 = vpop.f32.mrb[7].mxu1  ;;  %v6032_v15 = vld [vmem:[%s6644_s3 + $0x70] sm:$0xf]  ;;  %v6047_v20 = vpack.c.bf16 %v4044_v19, %v4043_v18 }
 0x2e4   :  { %v952_v27 = vmax.f32 %v868_v17, %v943_v22  ;;  %v6034_v17 = vpack.c.bf16 %v4042_v11, %v4041_v9  ;;  %v4049_v22 = vld [vmem:[%s6644_s3 + $0xa8] sm:$0xff]  ;;  %v82_v9 = vld [vmem:[%s6649_s8 + $0x20] sm:$0xff]  ;;  %v84_v19 = vld [vmem:[%s6649_s8 + $0x30] sm:$0xff] }
 0x2e5   :  { %v1052_v34 = vrot.slane %v953_v21, 1  ;;  %v1137_v35 = vrot.slane %v953_v21, 2  ;;  %v1222_v37 = vrot.slane %v953_v21, 3  ;;  %v1307_v39 = vrot.slane %v953_v21, 4  ;;  %v4048_v21 = vld [vmem:[%s6644_s3 + $0xa0] sm:$0xff]  ;;  %v83_v11 = vld [vmem:[%s6649_s8 + $0x28] sm:$0xff] }
 0x2e6   :  { %4580 = vmatmul.mubr.msk.f32.vlgmr.msra.gmra.mrb[8].mxu1 %vm960_vm10, %v952_v27  ;;  %v1051_v42 = vrot.slane %v952_v27, 1  ;;  %v1136_v44 = vrot.slane %v952_v27, 2  ;;  %v1221_v46 = vrot.slane %v952_v27, 3  ;;  %v1306_v47 = vrot.slane %v952_v27, 4  ;;  %v6063_v27 = vld [vmem:[%s6644_s3 + $0x98] sm:$0xf] }
 0x2e7   :  { %5143 = vmatpush3.bf16.msra.mxu1 %v5971_v26  ;;  %4592 = vmatprep.mubr.msk.f32.mxu1 %vm5501_vm1, %v5502_v6  ;;  %v6065_v28 = vpack.c.bf16 %v4049_v22, %v4048_v21  ;;  %v6147_v18 = vpack.c.bf16 %v83_v11, %v82_v9  ;;  %v85_v21 = vld [vmem:[%s6649_s8 + $0x38] sm:$0xff]  ;;  %v3975_v11 = vld [vmem:[%s6649_s8 + $0x60] sm:$0xff] }
 0x2e8   :  { %5144 = vmatprep.subr.bf16.mxu1 %v5500_v3  ;;  %v1053_v49 = vsel %vm213_vm5, %v1051_v42, %v1052_v34  ;;  %v1138_v50 = vsel %vm318_vm6, %v1136_v44, %v1137_v35  ;;  %v1223_v52 = vsel %vm423_vm7, %v1221_v46, %v1222_v37  ;;  %v1308_v53 = vsel %vm114_vm0, %v1306_v47, %v1307_v39  ;;  %v4051_v34 = vld [vmem:[%s6644_s3 + $0xb8] sm:$0xff]  ;;  %v6088_v37 = vld [vmem:[%s6644_s3 + $0xc0] sm:$0xf] }
 0x2e9   :  { %v6078_v35 = vpack.c.bf16 %v4051_v34, %v4050_v29  ;;  %v6099_v39 = vld [vmem:[%s6645_s4] ss:$0 sm:$0xff]  ;;  %v6158_v22 = vpack.c.bf16 %v85_v21, %v84_v19  ;;  %v3976_v19 = vld [vmem:[%s6649_s8 + $0x68] sm:$0xff] }
 0x2ea   :  { %v6190_v21 = vpack.c.bf16 %v3976_v19, %v3975_v11 }
 0x2eb   :  { %5146 = vmatpush3.bf16.msra.mxu1 %v5981_v48 }
 0x2ec   :  { %4590 = vmatprep.subr.mxu1 %v5502_v6 }
 0x2ef   :  { %4591 = vmatpush3.msk.msra.mxu1 %vm114_vm0, %v6001_v58 }
 0x2f0   :  { %4593 = vmatmul.mubr.msk.f32.vlgmr.msra.gmra.mrb[8].mxu1 %vm960_vm10, %v1053_v49  ;;  %5147 = vmatprep.subr.bf16.mxu1 %v5500_v3  ;;  %v6105_v49 = vld [vmem:[%s6648_s7] sm:$0xf] }
 0x2f1   :  { %5149 = vmatpush3.bf16.msra.mxu1 %v6003_v60  ;;  %4605 = vmatprep.mubr.msk.f32.mxu1 %vm5501_vm1, %v5502_v6 }
 0x2f2   :  { %5150 = vmatprep.subr.bf16.mxu1 %v5500_v3 }
 0x2f5   :  { %5152 = vmatpush3.bf16.msra.mxu1 %v6016_v5 }
 0x2f6   :  { %4603 = vmatprep.subr.mxu1 %v5502_v6 }
 0x2f9   :  { %4604 = vmatpush3.msk.msra.mxu1 %vm114_vm0, %v6032_v15 }
 0x2fa   :  { %4606 = vmatmul.mubr.msk.f32.vlgmr.msra.gmra.mrb[8].mxu1 %vm960_vm10, %v1138_v50  ;;  %5153 = vmatprep.subr.bf16.mxu1 %v5500_v3  ;;  %v78_v50 = vld [vmem:[%s6649_s8] sm:$0xff] }
 0x2fb   :  { %5155 = vmatpush3.bf16.msra.mxu1 %v6034_v17  ;;  %4618 = vmatprep.mubr.msk.f32.mxu1 %vm5501_vm1, %v5502_v6 }
 0x2fc   :  { %5156 = vmatprep.subr.bf16.mxu1 %v5500_v3 }
 0x2ff   :  { %5158 = vmatpush3.bf16.msra.mxu1 %v6047_v20 }
 0x300   :  { %4616 = vmatprep.subr.mxu1 %v5502_v6 }
 0x303   :  { %4617 = vmatpush3.msk.msra.mxu1 %vm114_vm0, %v6063_v27 }
 0x304   :  { %4619 = vmatmul.mubr.msk.f32.vlgmr.msra.gmra.mrb[8].mxu1 %vm960_vm10, %v1223_v52  ;;  %5159 = vmatprep.subr.bf16.mxu1 %v5500_v3  ;;  %v79_v52 = vld [vmem:[%s6649_s8 + $0x8] sm:$0xff] }
 0x305   :  { %5161 = vmatpush3.bf16.msra.mxu1 %v6065_v28  ;;  %4631 = vmatprep.mubr.msk.f32.mxu1 %vm5501_vm1, %v5502_v6  ;;  %v6123_v54 = vpack.c.bf16 %v79_v52, %v78_v50  ;;  %v3973_v52 = vld [vmem:[%s6649_s8 + $0x50] sm:$0xff] }
 0x306   :  { %5162 = vmatprep.subr.bf16.mxu1 %v5500_v3  ;;  %v6178_v9 = vpack.c.bf16 %v3974_v57, %v3973_v52  ;;  %v4078_v57 = vld [vmem:[%s6641_s0 + $0x38] sm:$0xf] }
 0x307   :  { %v2387_v8 = vrot.slane %v4078_v57, 4 }
 0x309   :  { %5164 = vmatpush3.bf16.msra.mxu1 %v6078_v35 }
 0x30a   :  { %4629 = vmatprep.subr.mxu1 %v5502_v6 }
 0x30d   :  { %4630 = vmatpush3.msk.msra.mxu1 %vm114_vm0, %v6088_v37 }
 0x30e   :  { %4632 = vmatmul.mubr.msk.f32.vlgmr.msra.gmra.mrb[8].mxu1 %vm960_vm10, %v1308_v53  ;;  %5189 = vmatprep.subr.bf16.mxu1 %v5500_v3  ;;  %v6121_v53 = vld [vmem:[%s6648_s7 + $0x4] sm:$0xf] }
 0x30f   :  { %4690 = vmatprep.mubr.msk.f32.mxu1 %vm5501_vm1, %v5502_v6 }
 0x3e1   :  { %v1380_v42 = vpop.f32.mrb[8].mxu1 }
 0x3e2   :  { %v5388_v44 = vadd.f32 %v6099_v39, %v1380_v42  ;;  %v4633_v46 = vpop.f32.mrb[9].mxu1  ;;  %v3971_v42 = vld [vmem:[%s6649_s8 + $0x40] sm:$0xff] }
 0x3e4   :  { %v1385_v47 = vmax.f32 %v5388_v44, 0.0  ;;  %v3972_v44 = vld [vmem:[%s6649_s8 + $0x48] sm:$0xff] }
 0x3e6   :  { %4635 = vmatpush3.msra.mxu0 %v1385_v47 }
 0x3e7   :  { %4637 = vmatmul.mubr.msk.f32.vlgmr.msra.gmra.mrb[6].mxu0 %vm1386_vm11, %v6105_v49  ;;  %4639 = vmatprep.subr.mxu0 %v5502_v6 }
 0x3e8   :  { %4640 = vmatpush3.msra.mxu0 %v1385_v47  ;;  %4641 = vmatprep.mubr.msk.f32.mxu0 %vm5501_vm1, %v5502_v6  ;;  %v6168_v47 = vpack.c.bf16 %v3972_v44, %v3971_v42  ;;  %v6216_v44 = vld [vmem:[%s6641_s0 + $0x20] sm:$0xff] }
 0x3e9   :  { %5165 = vmatprep.subr.bf16.mxu0 %v5500_v3  ;;  %v2190_v11 = vrot.slane %v6216_v44, 2 }
 0x3eb   :  { %4642 = vmatmul.mubr.msk.f32.vlgmr.msra.gmra.mrb[8].mxu0 %vm1386_vm11, %v6121_v53 }
 0x3ec   :  { %5167 = vmatpush3.bf16.msra.mxu0 %v6123_v54  ;;  %4660 = vmatprep.mubr.msk.f32.mxu0 %vm5501_vm1, %v5502_v6 }
 0x3ed   :  { %5168 = vmatprep.subr.bf16.mxu0 %v5500_v3 }
 0x3f0   :  { %5170 = vmatpush3.bf16.msra.mxu0 %v6135_v0 }
 0x3f1   :  { %5171 = vmatprep.subr.bf16.mxu0 %v5500_v3 }
 0x3f4   :  { %5173 = vmatpush3.bf16.msra.mxu0 %v6147_v18 }
 0x3f5   :  { %5174 = vmatprep.subr.bf16.mxu0 %v5500_v3 }
 0x3f8   :  { %5176 = vmatpush3.bf16.msra.mxu0 %v6158_v22 }
 0x3f9   :  { %5177 = vmatprep.subr.bf16.mxu0 %v5500_v3 }
 0x4ba   :  { %v1456_v29 = vpop.f32.mrb[6].mxu0 }
 0x4bb   :  { %v4638_v34 = vpop.f32.mrb[7].mxu0 }
 0x4bc   :  { %v3978_v34 = vld [vmem:[%s6649_s8 + $0x78] sm:$0xff] }
 0x4be   :  { %v1529_v46 = vpop.f32.mrb[8].mxu0 }
 0x4bf   :  { %v1533_v50 = vmax.f32 %v1456_v29, %v1529_v46  ;;  %v4643_v61 = vpop.f32.mrb[9].mxu0  ;;  %v3977_v29 = vld [vmem:[%s6649_s8 + $0x70] sm:$0xff] }
 0x4c0   :  { %v6200_v42 = vpack.c.bf16 %v3978_v34, %v3977_v29  ;;  %v2099_v61 = vrot.slane %v4078_v57, 1 }
 0x4c1   :  { %4661 = vmatmul.mubr.msk.f32.vlgmr.msra.gmra.mrb[10].mxu0 %vm1534_vm12, %v1533_v50 }
 0x4c2   :  { %5179 = vmatpush3.bf16.msra.mxu0 %v6168_v47  ;;  %4679 = vmatprep.mubr.msk.f32.mxu0 %vm5501_vm1, %v5502_v6 }
 0x4c3   :  { %5180 = vmatprep.subr.bf16.mxu0 %v5500_v3 }
 0x4c6   :  { %5182 = vmatpush3.bf16.msra.mxu0 %v6178_v9 }
 0x4c7   :  { %5183 = vmatprep.subr.bf16.mxu0 %v5500_v3 }
 0x4ca   :  { %5185 = vmatpush3.bf16.msra.mxu0 %v6190_v21 }
 0x4cb   :  { %5186 = vmatprep.subr.bf16.mxu0 %v5500_v3 }
 0x4ce   :  { %5188 = vmatpush3.bf16.msra.mxu0 %v6200_v42 }
 0x4cf   :  { %5213 = vmatprep.subr.bf16.mxu0 %v5500_v3 }
 0x4d1   :  { %4680 = vmatmul.mubr.msk.f32.vlgmr.msra.gmra.mrb[12].mxu0 %vm1534_vm12, %v1533_v50  ;;  %v6239_v50 = vld [vmem:[%s6641_s0 + $0x30] sm:$0xff] }
 0x4d2   :  { %5215 = vmatpush3.bf16.msra.mxu0 %v5595_v4  ;;  %4734 = vmatprep.mubr.msk.f32.mxu0 %vm5501_vm1, %v5502_v6  ;;  %v6226_v4 = vld [vmem:[%s6641_s0 + $0x28] sm:$0xff]  ;;  %v2097_v52 = vrot.slane %v6239_v50, 1  ;;  %v2193_v34 = vrot.slane %v6239_v50, 2 }
 0x4d3   :  { %5216 = vmatprep.subr.bf16.mxu0 %v5500_v3  ;;  %v2095_v46 = vrot.slane %v6226_v4, 1  ;;  %v2191_v19 = vrot.slane %v6226_v4, 2 }
 0x4d4   :  { %v2100_v29 = vsel %vm213_vm5, %v2097_v52, %v2099_v61 }
 0x4d6   :  { %5219 = vmatpush3.bf16.msk.msra.mxu0 %vm5608_vm3, %v5603_v7  ;;  %v2094_v7 = vrot.slane %v6216_v44, 1 }
 0x4d7   :  { %5220 = vmatprep.subr.bf16.mxu0 %v5500_v3 }
 0x4d9   :  { %4735 = vmatmul.mubr.msk.f32.vlgmr.msra.gmra.mrb[14].mxu0 %vm104_vm4, %v6216_v44 }
 0x4da   :  { %4737 = vmatprep.mubr.msk.f32.mxu0 %vm5501_vm1, %v5502_v6  ;;  %5222 = vmatpush3.bf16.msra.mxu0 %v5626_v12  ;;  %v2096_v12 = vsel %vm213_vm5, %v2094_v7, %v2095_v46  ;;  %v2194_v7 = vsel %vm318_vm6, %v2191_v19, %v2193_v34 }
 0x4db   :  { %5223 = vmatprep.subr.bf16.mxu0 %v5500_v3 }
 0x4dd   :  { %4738 = vmatmul.mubr.msk.f32.gmra.mrb[16].mxu0 %vm104_vm4, %v6226_v4 }
 0x4de   :  { %4740 = vmatprep.mubr.msk.f32.mxu0 %vm5501_vm1, %v5502_v6  ;;  %5226 = vmatpush3.bf16.msk.msra.mxu0 %vm5608_vm3, %v5645_v16  ;;  %v2098_v16 = vsel %vm213_vm5, %v2095_v46, %v2097_v52  ;;  %v2286_v46 = vrot.slane %v6216_v44, 3 }
 0x4df   :  { %5227 = vmatprep.subr.bf16.mxu0 %v5500_v3 }
 0x4e1   :  { %4741 = vmatmul.mubr.msk.f32.gmra.mrb[18].mxu0 %vm104_vm4, %v6239_v50 }
 0x4e2   :  { %4751 = vmatprep.mubr.msk.f32.mxu0 %vm5501_vm1, %v5502_v6 }
 0x4e5   :  { %4752 = vmatmul.mubr.msk.f32.vlgmr.msra.gmra.mrb[14].mxu0 %vm104_vm4, %v2096_v12  ;;  %v2287_v12 = vrot.slane %v6226_v4, 3 }
 0x4e6   :  { %4754 = vmatprep.mubr.msk.f32.mxu0 %vm5501_vm1, %v5502_v6  ;;  %5229 = vmatpush3.bf16.msra.mxu0 %v5675_v24  ;;  %v2192_v24 = vsel %vm318_vm6, %v2190_v11, %v2191_v19  ;;  %v2382_v11 = vrot.slane %v6216_v44, 4  ;;  %v2383_v19 = vrot.slane %v6226_v4, 4  ;;  %v2385_v44 = vrot.slane %v6239_v50, 4 }
 0x4e7   :  { %5230 = vmatprep.subr.bf16.mxu0 %v5500_v3 }
 0x4e8   :  { %v2386_v4 = vsel %vm114_vm0, %v2383_v19, %v2385_v44 }
 0x4e9   :  { %4755 = vmatmul.mubr.msk.f32.gmra.mrb[16].mxu0 %vm104_vm4, %v2098_v16  ;;  %v2289_v16 = vrot.slane %v6239_v50, 3  ;;  %v1681_v50 = vld [vmem:[%s6650_s9 + $0x8] sm:$0xff] }
 0x4ea   :  { %4757 = vmatprep.mubr.msk.f32.mxu0 %vm5501_vm1, %v5502_v6  ;;  %5233 = vmatpush3.bf16.msk.msra.mxu0 %vm5608_vm3, %v5694_v30  ;;  %v2195_v30 = vrot.slane %v4078_v57, 2 }
 0x4eb   :  { %5234 = vmatprep.subr.bf16.mxu0 %v5500_v3  ;;  %v2290_v61 = vsel %vm423_vm7, %v2287_v12, %v2289_v16 }
 0x4ec   :  { %v2196_v52 = vsel %vm318_vm6, %v2193_v34, %v2195_v30 }
 0x4ed   :  { %4758 = vmatmul.mubr.msk.f32.gmra.mrb[18].mxu0 %vm104_vm4, %v2100_v29 }
 0x4ee   :  { %4768 = vmatprep.mubr.msk.f32.mxu0 %vm5501_vm1, %v5502_v6 }
 0x4f1   :  { %4769 = vmatmul.mubr.msk.f32.vlgmr.msra.gmra.mrb[14].mxu0 %vm104_vm4, %v2192_v24 }
 0x4f2   :  { %4771 = vmatprep.mubr.msk.f32.mxu0 %vm5501_vm1, %v5502_v6  ;;  %5236 = vmatpush3.bf16.msra.mxu0 %v5718_v38  ;;  %v2288_v38 = vsel %vm423_vm7, %v2286_v46, %v2287_v12 }
 0x4f3   :  { %5237 = vmatprep.subr.bf16.mxu0 %v5500_v3 }
 0x4f5   :  { %4772 = vmatmul.mubr.msk.f32.gmra.mrb[16].mxu0 %vm104_vm4, %v2194_v7  ;;  %v4061_v7 = vld [vmem:[%s6650_s9 + $0x28] sm:$0xff] }
 0x4f6   :  { %4774 = vmatprep.mubr.msk.f32.mxu0 %vm5501_vm1, %v5502_v6  ;;  %5240 = vmatpush3.bf16.msk.msra.mxu0 %vm5608_vm3, %v5732_v43  ;;  %v2291_v43 = vrot.slane %v4078_v57, 3 }
 0x4f7   :  { %5241 = vmatprep.subr.bf16.mxu0 %v5500_v3 }
 0x4f8   :  { %v2292_v29 = vsel %vm423_vm7, %v2289_v16, %v2291_v43  ;;  %v4063_v16 = vld [vmem:[%s6650_s9 + $0x38] sm:$0xff]  ;;  %v4065_v43 = vld [vmem:[%s6650_s9 + $0x40] sm:$0xff] }
 0x4f9   :  { %4775 = vmatmul.mubr.msk.f32.gmra.mrb[18].mxu0 %vm104_vm4, %v2196_v52 }
 0x4fa   :  { %4785 = vmatprep.mubr.msk.f32.mxu0 %vm5501_vm1, %v5502_v6 }
 0x4fd   :  { %4786 = vmatmul.mubr.msk.f32.vlgmr.msra.gmra.mrb[14].mxu0 %vm104_vm4, %v2288_v38  ;;  %v4062_v38 = vld [vmem:[%s6650_s9 + $0x30] sm:$0xff] }
 0x4fe   :  { %4788 = vmatprep.mubr.msk.f32.mxu0 %vm5501_vm1, %v5502_v6  ;;  %5243 = vmatpush3.bf16.msra.mxu0 %v5756_v51  ;;  %v2384_v51 = vsel %vm114_vm0, %v2382_v11, %v2383_v19  ;;  %v4066_v11 = vld [vmem:[%s6650_s9 + $0x48] sm:$0xff] }
 0x4ff   :  { %5244 = vmatprep.subr.bf16.mxu0 %v5500_v3  ;;  %v6384_v19 = vpack.c.bf16 %v4066_v11, %v4065_v43 }
 0x501   :  { %4789 = vmatmul.mubr.msk.f32.gmra.mrb[16].mxu0 %vm104_vm4, %v2290_v61  ;;  %v6372_v61 = vpack.c.bf16 %v4063_v16, %v4062_v38 }
 0x502   :  { %4791 = vmatprep.mubr.msk.f32.mxu0 %vm5501_vm1, %v5502_v6  ;;  %5247 = vmatpush3.bf16.msk.msra.mxu0 %vm5608_vm3, %v5770_v56  ;;  %v2388_v56 = vsel %vm114_vm0, %v2385_v44, %v2387_v8  ;;  %v4068_v44 = vld [vmem:[%s6650_s9 + $0x58] sm:$0xff]  ;;  %v4070_v8 = vld [vmem:[%s6650_s9 + $0x60] sm:$0xff]  ;;  %vm3943_vm3 = vcmask 74752  }
 0x503   :  { %5273 = vmatprep.subr.bf16.mxu0 %v5888_v45 }
 0x505   :  { %4792 = vmatmul.mubr.msk.f32.gmra.mrb[18].mxu0 %vm104_vm4, %v2292_v29 }
 0x506   :  { %4802 = vmatprep.mubr.msk.f32.mxu0 %vm5501_vm1, %v5502_v6 }
 0x509   :  { %4803 = vmatmul.mubr.msk.f32.vlgmr.msra.gmra.mrb[14].mxu0 %vm104_vm4, %v2384_v51  ;;  %v4067_v51 = vld [vmem:[%s6650_s9 + $0x50] sm:$0xff] }
 0x50a   :  { %4805 = vmatprep.mubr.msk.f32.mxu0 %vm5501_vm1, %v5502_v6  ;;  %5275 = vmatpush3.bf16.msra.mxu0 %v5888_v45  ;;  %v1680_v45 = vld [vmem:[%s6650_s9] sm:$0xff] }
 0x50b   :  { %5277 = vmatprep.subr.bf16.mxu0 %v5898_v55  ;;  %v6338_v57 = vpack.c.bf16 %v1681_v50, %v1680_v45 }
 0x50d   :  { %4806 = vmatmul.mubr.msk.f32.gmra.mrb[16].mxu0 %vm104_vm4, %v2386_v4  ;;  %5191 = vmatpush3.bf16.msra.mxu1 %v6338_v57  ;;  %v6395_v4 = vpack.c.bf16 %v4068_v44, %v4067_v51 }
 0x50e   :  { %4808 = vmatprep.mubr.msk.f32.mxu0 %vm5501_vm1, %v5502_v6  ;;  %5279 = vmatpush3.bf16.msra.mxu0 %v5898_v55  ;;  %v1682_v55 = vld [vmem:[%s6650_s9 + $0x10] sm:$0xff] }
 0x50f   :  { %5281 = vmatprep.subr.bf16.mxu0 %v5911_v59  ;;  %5192 = vmatprep.subr.bf16.mxu1 %v5500_v3 }
 0x511   :  { %4809 = vmatmul.mubr.msk.f32.gmra.mrb[18].mxu0 %vm104_vm4, %v2388_v56  ;;  %v4071_v56 = vld [vmem:[%s6650_s9 + $0x68] sm:$0xff] }
 0x512   :  { %5283 = vmatpush3.bf16.msra.mxu0 %v5911_v59  ;;  %v1683_v59 = vld [vmem:[%s6650_s9 + $0x18] sm:$0xff]  ;;  %v6407_v45 = vpack.c.bf16 %v4071_v56, %v4070_v8 }
 0x513   :  { %5285 = vmatprep.subr.bf16.mxu0 %v5921_v62  ;;  %v6352_v24 = vpack.c.bf16 %v1683_v59, %v1682_v55  ;;  %v4072_v55 = vld [vmem:[%s6650_s9 + $0x70] sm:$0xff]  ;;  %v4073_v59 = vld [vmem:[%s6650_s9 + $0x78] sm:$0xff] }
 0x515   :  { %5194 = vmatpush3.bf16.msra.mxu1 %v6352_v24 }
 0x516   :  { %5287 = vmatpush3.bf16.msra.mxu0 %v5921_v62  ;;  %5195 = vmatprep.subr.bf16.mxu1 %v5500_v3 }
 0x517   :  { %4866 = vmatprep.subr.mxu0 %v5928_v63 }
 0x51a   :  { %4867 = vmatpush3.msra.mxu0 %v5928_v63  ;;  %v4060_v63 = vld [vmem:[%s6650_s9 + $0x20] sm:$0xff] }
 0x51b   :  { %4936 = vmatprep.subr.mxu0 %v5502_v6  ;;  %v6362_v46 = vpack.c.bf16 %v4061_v7, %v4060_v63 }
 0x594   :  { %v1604_v62 = vpop.f32.mrb[10].mxu0 }
 0x595   :  { %v4662_v34 = vpop.f32.mrb[11].mxu0 }
 0x5a4   :  { %v1674_v30 = vpop.f32.mrb[12].mxu0 }
 0x5a5   :  { %v1678_v12 = vmax.f32 %v1604_v62, %v1674_v30  ;;  %v4681_v52 = vpop.f32.mrb[13].mxu0  ;;  %v6418_v62 = vpack.c.bf16 %v4073_v59, %v4072_v55 }
 0x5a7   :  { %4691 = vmatmul.mubr.msk.f32.vlgmr.msra.gmra.mrb[10].mxu1 %vm1684_vm13, %v1678_v12  ;;  %v1764_v29 = vrot.slane %v1678_v12, 1  ;;  %v1843_v50 = vrot.slane %v1678_v12, 2  ;;  %v1922_v34 = vrot.slane %v1678_v12, 3 }
 0x5a8   :  { %5197 = vmatpush3.bf16.msra.mxu1 %v6362_v46  ;;  %4701 = vmatprep.mubr.msk.f32.mxu1 %vm5501_vm1, %v5502_v6 }
 0x5a9   :  { %5198 = vmatprep.subr.bf16.mxu1 %v5500_v3 }
 0x5ac   :  { %5200 = vmatpush3.bf16.msra.mxu1 %v6372_v61 }
 0x5ad   :  { %5201 = vmatprep.subr.bf16.mxu1 %v5500_v3 }
 0x5af   :  { %4702 = vmatmul.mubr.msk.f32.vlgmr.msra.gmra.mrb[10].mxu1 %vm1684_vm13, %v1764_v29 }
 0x5b0   :  { %5203 = vmatpush3.bf16.msra.mxu1 %v6384_v19  ;;  %4712 = vmatprep.mubr.msk.f32.mxu1 %vm5501_vm1, %v5502_v6 }
 0x5b1   :  { %5204 = vmatprep.subr.bf16.mxu1 %v5500_v3 }
 0x5b4   :  { %5206 = vmatpush3.bf16.msra.mxu1 %v6395_v4 }
 0x5b5   :  { %5207 = vmatprep.subr.bf16.mxu1 %v5500_v3 }
 0x5b7   :  { %4713 = vmatmul.mubr.msk.f32.vlgmr.msra.gmra.mrb[10].mxu1 %vm1684_vm13, %v1843_v50 }
 0x5b8   :  { %5209 = vmatpush3.bf16.msra.mxu1 %v6407_v45  ;;  %4723 = vmatprep.mubr.msk.f32.mxu1 %vm5501_vm1, %v5502_v6 }
 0x5b9   :  { %5210 = vmatprep.subr.bf16.mxu1 %v5500_v3 }
 0x5bc   :  { %5212 = vmatpush3.bf16.msra.mxu1 %v6418_v62 }
 0x5bf   :  { %4724 = vmatmul.mubr.msk.f32.vlgmr.msra.gmra.mrb[10].mxu1 %vm1684_vm13, %v1922_v34 }
 0x5c0   :  { %4817 = vmatprep.mubr.msk.f32.mxu1 %vm630_vm8, %v5803_v1 }
 0x5dc   :  { %v2461_v63 = vpop.f32.mrb[14].mxu0 }
 0x5dd   :  { %v4804_v7 = vpop.f32.mrb[15].mxu0  ;;  %v5390_v30 = vadd.f32 %v5810_v2, %v2461_v63 }
 0x5df   :  { %v2478_v43 = vmax.f32 %v5390_v30, 0.0 }
 0x5e0   :  { %v2466_v52 = vpop.f32.mrb[16].mxu0 }
 0x5e1   :  { %v5391_v38 = vadd.f32 %v5810_v2, %v2466_v52  ;;  %v4807_v16 = vpop.f32.mrb[17].mxu0 }
 0x5e3   :  { %v2479_v11 = vmax.f32 %v5391_v38, 0.0 }
 0x5e4   :  { %v2471_v29 = vpop.f32.mrb[18].mxu0 }
 0x5e5   :  { %v5248_v51 = vpack.c.bf16 %v2479_v11, %v2478_v43  ;;  %v5392_v44 = vadd.f32 %v5810_v2, %v2471_v29  ;;  %v4810_v12 = vpop.f32.mrb[19].mxu0 }
 0x5e7   :  { %v2480_v8 = vmax.f32 %v5392_v44, 0.0  ;;  %5249 = vmatprep.subr.bf16.mxu1 %v5248_v51  ;;  %v1679_v44 = vld [vmem:[%s6651_s10] sm:$0x1] }
 0x5e8   :  { %5251 = vmatpush3.bf16.msra.mxu1 %v5248_v51 }
 0x5e9   :  { %4815 = vmatprep.subr.mxu1 %v2480_v8 }
 0x5ec   :  { %4816 = vmatpush3.msra.mxu1 %v2480_v8 }
 0x5ed   :  { %5253 = vmatprep.subr.bf16.mxu1 %v5248_v51  ;;  %4818 = vmatmul.mubr.msk.f32.vlgmr.msra.gmra.mrb[12].mxu1 %vm630_vm8, %v5818_v23 }
 0x5ee   :  { %5255 = vmatpush3.bf16.msra.mxu1 %v5248_v51  ;;  %4826 = vmatprep.mubr.msk.f32.mxu1 %vm630_vm8, %v5823_v25 }
 0x5ef   :  { %4824 = vmatprep.subr.mxu1 %v2480_v8 }
 0x5f2   :  { %4825 = vmatpush3.msra.mxu1 %v2480_v8 }
 0x5f3   :  { %4827 = vmatmul.mubr.msk.f32.vlgmr.msra.gmra.mrb[14].mxu1 %vm630_vm8, %v5846_v32  ;;  %5257 = vmatprep.subr.bf16.mxu1 %v5841_v31 }
 0x5f4   :  { %5259 = vmatpush3.bf16.msra.mxu1 %v5841_v31 }
 0x5f5   :  { %5261 = vmatprep.subr.bf16.mxu1 %v5848_v33 }
 0x5f8   :  { %5263 = vmatpush3.bf16.msra.mxu1 %v5848_v33 }
 0x5f9   :  { %5265 = vmatprep.subr.bf16.mxu1 %v5862_v36 }
 0x5fc   :  { %5267 = vmatpush3.bf16.msra.mxu1 %v5862_v36 }
 0x5fd   :  { %5269 = vmatprep.subr.bf16.mxu1 %v5872_v40 }
 0x600   :  { %5271 = vmatpush3.bf16.msra.mxu1 %v5872_v40 }
 0x601   :  { %4845 = vmatprep.subr.mxu1 %v5879_v41 }
 0x604   :  { %4846 = vmatpush3.msra.mxu1 %v5879_v41 }
 0x605   :  { %5288 = vmatprep.subr.bf16.mxu1 %v5500_v3 }
 0x692   :  { %v6447_v1 = vpop.f32.mrb[10].mxu1 }
 0x693   :  { %v4725_v2 = vpop.f32.mrb[11].mxu1 }
 0x6c0   :  { %v4819_v23 = vpop.f32.mrb[12].mxu1 }
 0x6c1   :  { %v2547_v25 = vpop.f32.mrb[13].mxu1 }
 0x6c6   :  { %v4828_v31 = vpop.f32.mrb[14].mxu1 }
 0x6c7   :  { %v2632_v32 = vmax.f32 %v4819_v23, %v4828_v31  ;;  %v2622_v33 = vpop.f32.mrb[15].mxu1  ;;  %v3855_v23 = vld [vmem:[%s6654_s13] sm:$0xff]  ;;  %v5389_v31 = vadd.f32 %v6447_v1, %v1679_v44  ;;  %v3858_v1 = vld [vmem:[%s6654_s13 + $0x18] sm:$0x3f] }
 0x6c8   :  { %v2631_v56 = vmax.f32 %v2547_v25, %v2622_v33  ;;  %v3856_v25 = vld [vmem:[%s6654_s13 + $0x8] sm:$0xff] }
 0x6ca   :  { %4847 = vmatprep.mubr.msk.f32.mxu1 %vm795_vm9, %v2631_v56  ;;  %4868 = vmatprep.mubr.msk.f32.mxu0 %vm795_vm9, %v2631_v56  ;;  %v5379_v56 = vpack.c.bf16 %v3856_v25, %v3855_v23 }
 0x6cb   :  { %4848 = vmatmul.mubr.msk.f32.vlgmr.msra.gmra.mrb[16].mxu1 %vm795_vm9, %v2632_v32  ;;  %4869 = vmatmul.mubr.msk.f32.vlgmr.msra.gmra.mrb[20].mxu0 %vm795_vm9, %v2632_v32 }
 0x6cc   :  { %5290 = vmatpush3.bf16.msra.mxu1 %v5946_v10  ;;  %4881 = vmatprep.mubr.msk.f32.mxu1 %vm5501_vm1, %v5502_v6 }
 0x6cd   :  { %5291 = vmatprep.subr.bf16.mxu1 %v5500_v3  ;;  %4938 = vmatprep.mubr.msk.f32.mxu0 %vm5501_vm1, %v5502_v6 }
 0x6d0   :  { %5293 = vmatpush3.bf16.msra.mxu1 %v5952_v13 }
 0x6d1   :  { %4879 = vmatprep.subr.mxu1 %v5502_v6 }
 0x6d4   :  { %4880 = vmatpush3.msk.msra.mxu1 %vm114_vm0, %v5960_v14 }
 0x6d5   :  { %5294 = vmatprep.subr.bf16.mxu1 %v5500_v3 }
 0x79e   :  { %v4849_v36 = vpop.f32.mrb[16].mxu1  ;;  %v4870_v40 = vpop.f32.mrb[20].mxu0 }
 0x79f   :  { %v2790_v41 = vmax.f32 %v4849_v36, %v4870_v40  ;;  %v2705_v10 = vpop.f32.mrb[17].mxu1  ;;  %v2780_v50 = vpop.f32.mrb[21].mxu0  ;;  %v3857_v40 = vld [vmem:[%s6654_s13 + $0x10] sm:$0xff]  ;;  %s5504_s13 = smov [#allocation2]  }
 0x7a0   :  { %v2789_v55 = vmax.f32 %v2705_v10, %v2780_v50  ;;  %v4125_v10 = vld [vmem:[%s6653_s12] ss:$0 sm:$0xff]  ;;  %s3951_s6 = sshll.u32 %s5504_s13, 4  ;;  %s3952_s6 = int_to_ptr.vmem [resolvable:$true] %s3951_s6 }
 0x7a1   :  { %v2867_v59 = vrot.slane %v2790_v41, 1  ;;  %v2943_v34 = vrot.slane %v2790_v41, 2  ;;  %v3019_v63 = vrot.slane %v2790_v41, 3  ;;  %v3095_v7 = vrot.slane %v2790_v41, 4  ;;  %s5476_s17 = scalar_lea.vmem %s3952_s6, 32  ;;  %p5481_p1 = scmp.lt.s32.totalorder %s3952_s6, %s3952_s6 }
 0x7a2   :  { %4882 = vmatmul.mubr.msk.f32.vlgmr.msra.gmra.mrb[18].mxu1 %vm960_vm10, %v2789_v55  ;;  %v2866_v13 = vrot.slane %v2789_v55, 1  ;;  %v2942_v30 = vrot.slane %v2789_v55, 2  ;;  %v3018_v52 = vrot.slane %v2789_v55, 3  ;;  %v3094_v38 = vrot.slane %v2789_v55, 4  ;;  %p5477_p0 = scmp.ne.s32.totalorder %s3952_s6, %s5476_s17  ;;  %p5482_p2 = scmp.lt.s32.totalorder %s5476_s17, %s5476_s17 }
 0x7a3   :  { %5296 = vmatpush3.bf16.msra.mxu1 %v5971_v26  ;;  %4894 = vmatprep.mubr.msk.f32.mxu1 %vm5501_vm1, %v5502_v6  ;;  %v5382_v41 = vpack.c.bf16 %v3858_v1, %v3857_v40 }
 0x7a4   :  { %5297 = vmatprep.subr.bf16.mxu1 %v5500_v3  ;;  %v2868_v14 = vsel %vm213_vm5, %v2866_v13, %v2867_v59  ;;  %v2944_v16 = vsel %vm318_vm6, %v2942_v30, %v2943_v34  ;;  %v3020_v43 = vsel %vm423_vm7, %v3018_v52, %v3019_v63  ;;  %v3096_v11 = vsel %vm114_vm0, %v3094_v38, %v3095_v7  ;;  %v4128_v59 = vld [vmem:[%s6655_s14] ss:$0 sm:$0xff]  ;;  %p5483_p3 = por %p5482_p2, %p5481_p1 }
 0x7a6   :  { %p5484_p4 = pnand %p5483_p3, %p5477_p0 }
 0x7a7   :  { %5299 = vmatpush3.bf16.msra.mxu1 %v5981_v48 }
 0x7a8   :  { %4892 = vmatprep.subr.mxu1 %v5502_v6 }
 0x7ab   :  { %4893 = vmatpush3.msk.msra.mxu1 %vm114_vm0, %v6001_v58 }
 0x7ac   :  { %4895 = vmatmul.mubr.msk.f32.vlgmr.msra.gmra.mrb[18].mxu1 %vm960_vm10, %v2868_v14  ;;  %5300 = vmatprep.subr.bf16.mxu1 %v5500_v3 }
 0x7ad   :  { %5302 = vmatpush3.bf16.msra.mxu1 %v6003_v60  ;;  %4907 = vmatprep.mubr.msk.f32.mxu1 %vm5501_vm1, %v5502_v6 }
 0x7ae   :  { %5303 = vmatprep.subr.bf16.mxu1 %v5500_v3 }
 0x7b1   :  { %5305 = vmatpush3.bf16.msra.mxu1 %v6016_v5 }
 0x7b2   :  { %4905 = vmatprep.subr.mxu1 %v5502_v6 }
 0x7b5   :  { %4906 = vmatpush3.msk.msra.mxu1 %vm114_vm0, %v6032_v15 }
 0x7b6   :  { %4908 = vmatmul.mubr.msk.f32.vlgmr.msra.gmra.mrb[18].mxu1 %vm960_vm10, %v2944_v16  ;;  %5306 = vmatprep.subr.bf16.mxu1 %v5500_v3 }
 0x7b7   :  { %5308 = vmatpush3.bf16.msra.mxu1 %v6034_v17  ;;  %4920 = vmatprep.mubr.msk.f32.mxu1 %vm5501_vm1, %v5502_v6 }
 0x7b8   :  { %5309 = vmatprep.subr.bf16.mxu1 %v5500_v3 }
 0x7bb   :  { %5311 = vmatpush3.bf16.msra.mxu1 %v6047_v20 }
 0x7bc   :  { %4918 = vmatprep.subr.mxu1 %v5502_v6 }
 0x7bf   :  { %4919 = vmatpush3.msk.msra.mxu1 %vm114_vm0, %v6063_v27 }
 0x7c0   :  { %4921 = vmatmul.mubr.msk.f32.vlgmr.msra.gmra.mrb[18].mxu1 %vm960_vm10, %v3020_v43  ;;  %5312 = vmatprep.subr.bf16.mxu1 %v5500_v3 }
 0x7c1   :  { %5314 = vmatpush3.bf16.msra.mxu1 %v6065_v28  ;;  %4933 = vmatprep.mubr.msk.f32.mxu1 %vm5501_vm1, %v5502_v6  ;;  %v3761_v28 = vld [vmem:[%s6652_s11] sm:$0xff] }
 0x7c2   :  { %5315 = vmatprep.subr.bf16.mxu1 %v5500_v3 }
 0x7c5   :  { %5317 = vmatpush3.bf16.msra.mxu1 %v6078_v35  ;;  %v3762_v35 = vld [vmem:[%s6652_s11 + $0x8] sm:$0xff] }
 0x7c6   :  { %4931 = vmatprep.subr.mxu1 %v5502_v6 }
 0x7c9   :  { %4932 = vmatpush3.msk.msra.mxu1 %vm114_vm0, %v6088_v37  ;;  %v3763_v37 = vld [vmem:[%s6652_s11 + $0x10] sm:$0xff]  ;;  %vm5383_vm0 = vmpackc.low %vm318_vm6, %vm5503_vm2 }
 0x7ca   :  { %4934 = vmatmul.mubr.msk.f32.vlgmr.msra.gmra.mrb[18].mxu1 %vm960_vm10, %v3096_v11  ;;  %5342 = vmatprep.subr.bf16.mxu1 %v5500_v3 }
 0x7cb   :  { %5344 = vmatpush3.bf16.msra.mxu1 %v6338_v57  ;;  %4992 = vmatprep.mubr.msk.f32.mxu1 %vm5501_vm1, %v5502_v6 }
 0x7cc   :  { %5345 = vmatprep.subr.bf16.mxu1 %v5500_v3 }
 0x7cf   :  { %5347 = vmatpush3.bf16.msra.mxu1 %v6352_v24 }
 0x7d0   :  { %5348 = vmatprep.subr.bf16.mxu1 %v5500_v3 }
 0x89d   :  { %v3165_v26 = vpop.f32.mrb[18].mxu1 }
 0x89e   :  { %v5393_v48 = vadd.f32 %v6099_v39, %v3165_v26  ;;  %v4935_v58 = vpop.f32.mrb[19].mxu1  ;;  %v5367_v39 = vpack.c.bf16 %v3762_v35, %v3761_v28 }
 0x8a0   :  { %v3170_v60 = vmax.f32 %v5393_v48, 0.0 }
 0x8a2   :  { %4937 = vmatpush3.msra.mxu0 %v3170_v60 }
 0x8a3   :  { %4939 = vmatmul.mubr.msk.f32.vlgmr.msra.gmra.mrb[22].mxu0 %vm1386_vm11, %v6105_v49  ;;  %4941 = vmatprep.subr.mxu0 %v5502_v6  ;;  %v3764_v49 = vld [vmem:[%s6652_s11 + $0x18] sm:$0xff] }
 0x8a4   :  { %4942 = vmatpush3.msra.mxu0 %v3170_v60  ;;  %4943 = vmatprep.mubr.msk.f32.mxu0 %vm5501_vm1, %v5502_v6 }
 0x8a5   :  { %5318 = vmatprep.subr.bf16.mxu0 %v5500_v3 }
 0x8a7   :  { %4944 = vmatmul.mubr.msk.f32.vlgmr.msra.gmra.mrb[24].mxu0 %vm1386_vm11, %v6121_v53  ;;  %v5370_v53 = vpack.c.bf16 %v3764_v49, %v3763_v37 }
 0x8a8   :  { %5320 = vmatpush3.bf16.msra.mxu0 %v6123_v54  ;;  %4962 = vmatprep.mubr.msk.f32.mxu0 %vm5501_vm1, %v5502_v6  ;;  %v3765_v54 = vld [vmem:[%s6652_s11 + $0x20] sm:$0xff] }
 0x8a9   :  { %5321 = vmatprep.subr.bf16.mxu0 %v5500_v3 }
 0x8ac   :  { %5323 = vmatpush3.bf16.msra.mxu0 %v6135_v0  ;;  %v3766_v0 = vld [vmem:[%s6652_s11 + $0x28] sm:$0xff] }
 0x8ad   :  { %5324 = vmatprep.subr.bf16.mxu0 %v5500_v3 }
 0x8b0   :  { %5326 = vmatpush3.bf16.msra.mxu0 %v6147_v18  ;;  %v5373_v18 = vpack.c.bf16 %v3766_v0, %v3765_v54 }
 0x8b1   :  { %5327 = vmatprep.subr.bf16.mxu0 %v5500_v3 }
 0x8b4   :  { %5329 = vmatpush3.bf16.msra.mxu0 %v6158_v22 }
 0x8b5   :  { %5330 = vmatprep.subr.bf16.mxu0 %v5500_v3 }
 0x976   :  { %v3237_v5 = vpop.f32.mrb[22].mxu0 }
 0x977   :  { %v4940_v15 = vpop.f32.mrb[23].mxu0 }
 0x97a   :  { %v3307_v17 = vpop.f32.mrb[24].mxu0 }
 0x97b   :  { %v3311_v20 = vmax.f32 %v3237_v5, %v3307_v17  ;;  %v4945_v27 = vpop.f32.mrb[25].mxu0 }
 0x97d   :  { %4963 = vmatmul.mubr.msk.f32.vlgmr.msra.gmra.mrb[26].mxu0 %vm1534_vm12, %v3311_v20 }
 0x97e   :  { %5332 = vmatpush3.bf16.msra.mxu0 %v6168_v47  ;;  %4981 = vmatprep.mubr.msk.f32.mxu0 %vm5501_vm1, %v5502_v6 }
 0x97f   :  { %5333 = vmatprep.subr.bf16.mxu0 %v5500_v3 }
 0x982   :  { %5335 = vmatpush3.bf16.msra.mxu0 %v6178_v9 }
 0x983   :  { %5336 = vmatprep.subr.bf16.mxu0 %v5500_v3 }
 0x986   :  { %5338 = vmatpush3.bf16.msra.mxu0 %v6190_v21 }
 0x987   :  { %5339 = vmatprep.subr.bf16.mxu0 %v5500_v3 }
 0x98a   :  { %5341 = vmatpush3.bf16.msra.mxu0 %v6200_v42 }
 0x98b   :  { %5366 = vmatprep.subr.bf16.mxu0 %v5500_v3 }
 0x98d   :  { %4982 = vmatmul.mubr.msk.f32.vlgmr.msra.gmra.mrb[28].mxu0 %vm1534_vm12, %v3311_v20 }
 0x98e   :  { %5046 = vmatprep.mubr.msk.f32.mxu0 %vm5501_vm1, %v5502_v6  ;;  %5368 = vmatpush3.bf16.msra.mxu0 %v5367_v39 }
 0x98f   :  { %5369 = vmatprep.subr.bf16.mxu0 %v5500_v3 }
 0x992   :  { %5371 = vmatpush3.bf16.msra.mxu0 %v5370_v53 }
 0x993   :  { %5372 = vmatprep.subr.bf16.mxu0 %v5500_v3 }
 0x996   :  { %5374 = vmatpush3.bf16.msra.mxu0 %v5373_v18 }
 0x997   :  { %5375 = vmatprep.subr.bf16.mxu0 %v5500_v3 }
 0xa50   :  { %v3381_v22 = vpop.f32.mrb[26].mxu0 }
 0xa51   :  { %v4964_v47 = vpop.f32.mrb[27].mxu0 }
 0xa60   :  { %v3451_v9 = vpop.f32.mrb[28].mxu0 }
 0xa61   :  { %v3455_v21 = vmax.f32 %v3381_v22, %v3451_v9  ;;  %v4983_v42 = vpop.f32.mrb[29].mxu0 }
 0xa63   :  { %4993 = vmatmul.mubr.msk.f32.vlgmr.msra.gmra.mrb[20].mxu1 %vm1684_vm13, %v3455_v21  ;;  %v3530_v57 = vrot.slane %v3455_v21, 1  ;;  %v3604_v24 = vrot.slane %v3455_v21, 2 }
 0xa64   :  { %5350 = vmatpush3.bf16.msra.mxu1 %v6362_v46  ;;  %5003 = vmatprep.mubr.msk.f32.mxu1 %vm5501_vm1, %v5502_v6  ;;  %v3678_v46 = vrot.slane %v3455_v21, 3 }
 0xa65   :  { %5351 = vmatprep.subr.bf16.mxu1 %v5500_v3 }
 0xa68   :  { %5353 = vmatpush3.bf16.msra.mxu1 %v6372_v61  ;;  %v3767_v61 = vld [vmem:[%s6652_s11 + $0x30] sm:$0xff] }
 0xa69   :  { %5354 = vmatprep.subr.bf16.mxu1 %v5500_v3 }
 0xa6b   :  { %5004 = vmatmul.mubr.msk.f32.vlgmr.msra.gmra.mrb[20].mxu1 %vm1684_vm13, %v3530_v57 }
 0xa6c   :  { %5356 = vmatpush3.bf16.msra.mxu1 %v6384_v19  ;;  %5014 = vmatprep.mubr.msk.f32.mxu1 %vm5501_vm1, %v5502_v6  ;;  %v3768_v19 = vld [vmem:[%s6652_s11 + $0x38] sm:$0xff] }
 0xa6d   :  { %5357 = vmatprep.subr.bf16.mxu1 %v5500_v3 }
 0xa70   :  { %5359 = vmatpush3.bf16.msra.mxu1 %v6395_v4  ;;  %v5376_v4 = vpack.c.bf16 %v3768_v19, %v3767_v61 }
 0xa71   :  { %5360 = vmatprep.subr.bf16.mxu1 %v5500_v3 }
 0xa72   :  { %5377 = vmatpush3.bf16.msra.mxu0 %v5376_v4 }
 0xa73   :  { %5015 = vmatmul.mubr.msk.f32.vlgmr.msra.gmra.mrb[20].mxu1 %vm1684_vm13, %v3604_v24  ;;  %5044 = vmatprep.subr.mxu0 %v5502_v6 }
 0xa74   :  { %5362 = vmatpush3.bf16.msra.mxu1 %v6407_v45  ;;  %5025 = vmatprep.mubr.msk.f32.mxu1 %vm5501_vm1, %v5502_v6  ;;  %v3769_v45 = vld [vmem:[%s6652_s11 + $0x40] sm:$0x3f] }
 0xa75   :  { %5363 = vmatprep.subr.bf16.mxu1 %v5500_v3 }
 0xa76   :  { %5045 = vmatpush3.msk.msra.mxu0 %vm318_vm6, %v3769_v45 }
 0xa77   :  { %5378 = vmatprep.subr.bf16.mxu0 %v5500_v3 }
 0xa78   :  { %5365 = vmatpush3.bf16.msra.mxu1 %v6418_v62  ;;  %v3753_v62 = vlaneseq }
 0xa7a   :  { %v3754_v29 = vshrl.u32 %v3753_v62, 7 }
 0xa7b   :  { %5026 = vmatmul.mubr.msk.f32.vlgmr.msra.gmra.mrb[20].mxu1 %vm1684_vm13, %v3678_v46 }
 0xa7c   :  { %v3755_v51 = vsub.s32 0, %v3754_v29 }
 0xb4e   :  { %v3747_v12 = vpop.f32.mrb[20].mxu1 }
 0xb4f   :  { %v5394_v8 = vadd.f32 %v3747_v12, %v1679_v44  ;;  %v5027_v2 = vpop.f32.mrb[21].mxu1 }
 0xb51   :  { %v3756_v32 = vrot.slane %v5394_v8, %v3755_v51 }
 0xb53   :  { %v3759_v33 = vsel %vm3758_vm14, %v5389_v31, %v3756_v32 }
 0xb54   :  { %v3760_v36 = vmax.f32 %v3759_v33, 0.0 }
 0xb56   :  { %5047 = vmatmul.mubr.msk.f32.vlgmr.msra.gmra.mrb[30].mxu0 %vm3777_vm15, %v3760_v36 }
 0xb57   :  { %5380 = vmatpush3.bf16.msra.mxu0 %v5379_v56  ;;  %5057 = vmatprep.mubr.msk.f32.mxu0 %vm5501_vm1, %v5502_v6  ;;  %vm3866_vm1 = vcmask 244736  }
 0xb58   :  { %5381 = vmatprep.subr.bf16.mxu0 %v5500_v3 }
 0xb5b   :  { %5384 = vmatpush3.bf16.msk.msra.mxu0 %vm5383_vm0, %v5382_v41 }
 0xc29   :  { %v3850_v6 = vpop.f32.mrb[30].mxu0 }
 0xc2a   :  { %v3851_v50 = vadd.f32 %v4125_v10, %v3850_v6  ;;  %v5048_v3 = vpop.f32.mrb[31].mxu0 }
 0xc2c   :  { %v3854_v55 = vmax.f32 %v3851_v50, 0.0 }
 0xc2e   :  { %5058 = vmatmul.mubr.msk.f32.vlgmr.msra.gmra.mrb[32].mxu0 %vm3866_vm1, %v3854_v55 }
 0xd01   :  { %v3939_v34 = vpop.f32.mrb[32].mxu0 }
 0xd02   :  { %v3940_v63 = vadd.f32 %v4128_v59, %v3939_v34  ;;  %v5059_v7 = vpop.f32.mrb[33].mxu0 }
 0xd04   :  { %3944 = vst.msk [vmem:[#allocation2] sm:$0x3] %vm3943_vm3, %v3940_v63 }
 0xd05   :  { %5487 = shalt.err (!%p5484_p4)
}
 0xd06   :  { %s5488_s18 = scalar_lea.hbm %s6656_s15, 32 }
 0xd07   :  { %p5489_p5 = scmp.ne.s32.totalorder %s6656_s15, %s5488_s18  ;;  %p5492_p6 = scmp.lt.u32.totalorder %s5488_s18, %s6656_s15 }
 0xd09   :  { %p5494_p7 = pnand %p5492_p6, %p5489_p5 }
 0xd0b   :  { %5497 = shalt.err (!%p5494_p7)
}
 0xd0c   :  { %3954 = dma.vmem_to_hbm [thread:$0]  %s3952_s6, 32, %s6656_s15, [#allocation3]  }
 0xd0d   :  { %5498 = dma.done.wait [#allocation3], 32  }
 0xd0e   :  { %5499 = vsyncadd [#allocation3], 4294967264 }
 0xd0f   :  { %3958 = vsyncpa [#allocation3], 1 }

</bundles_post_ra>
